<compile_context>
chip_gen: v7x
topology: tpu7x:2x2x1
jax: 0.10.0
libtpu: 0.0.40
codegen_flags: <defaults>
</compile_context>

<pallas_src>
import math
from functools import partial

import jax
import jax.numpy as jnp
import numpy as np
from jax.experimental import pallas as pl
from jax.experimental.pallas import tpu as pltpu  # noqa: F401  (TPU backend registration)

_GATE_PERM = [0, 1, 3, 2]  # PyTorch gate order (i, f, g, o) -> kernel order (i, f, o, g)
_GATE_SCALE = np.array([0.5, 0.5, 0.5, 1.0], np.float32)  # pre-halve the sigmoid gates


# ----------------------------------------------------------------------------- fused kernel

def _make_fused_kernel(T, B, H, D, num_layers):
    """Fused SeriesLSTM forward for static shapes.

    Column layout per layer (kernel gate order i,f,o,g):
      W_ih_all : (in_sz, 4*D*H)  column (k, d, m) = k*D*H + d*H + m
      W_hh_bd  : (D*H, 4*D*H)    block-diagonal over directions
      b_all    : (1, 4*D*H)      b_ih + b_hh
    i/f/o columns of W_ih_all / W_hh_bd / b_all are pre-scaled by 0.5 so that
    sigmoid(z) == 0.5 * tanh(gates) + 0.5.
    Hidden/cell state is (B, D*H) with direction d in columns [d*H:(d+1)*H].
    """
    DH = D * H
    G = 4 * DH
    S = 3 * DH  # width of the sigmoid (i, f, o) gate block

    def kernel(*refs):
        x_ref = refs[0]
        w_fc_ref = refs[1 + 3 * num_layers]
        b_fc_ref = refs[2 + 3 * num_layers]
        out_ref = refs[3 + 3 * num_layers]

        # Lane masks for the forward direction, built once (hoisted out of all loops).
        if D == 2:
            lane_g = jax.lax.broadcasted_iota(jnp.int32, (1, G), 1)
            fwd_mask_g = (lane_g % DH) < H          # forward gate columns
            lane_h = jax.lax.broadcasted_iota(jnp.int32, (1, DH), 1)
            fwd_mask_h = lane_h < H                 # forward hidden columns

        # Time-major flattened sequence: row block t = the batch at timestep t.
        seq = x_ref[...]                            # (T*B, in_sz)
        last = None

        for layer in range(num_layers):
            w_ih_ref = refs[1 + 3 * layer]          # (in_sz, G)
            whh_ref = refs[2 + 3 * layer]           # (DH, G)
            b_ref = refs[3 + 3 * layer]             # (1, G)

            # Hoisted input projection + bias for the WHOLE sequence, both directions.
            xp = (
                jnp.dot(seq, w_ih_ref[...], preferred_element_type=jnp.float32)
                + b_ref[...]
            )                                       # (T*B, G)

            # Hoisted direction select: forward columns read timestep t, backward columns
            # read timestep T-1-t.  One full-occupancy select off the critical path.
            if D == 2:
                xp_rev = jnp.concatenate(
                    [xp[(T - 1 - t) * B:(T - t) * B] for t in range(T)], axis=0)
                gx_all = jnp.where(fwd_mask_g, xp, xp_rev)
            else:
                gx_all = xp

            whh = whh_ref[...]
            h = jnp.zeros((B, DH), jnp.float32)
            c = jnp.zeros((B, DH), jnp.float32)
            h_first = None
            h_steps = [] if layer < num_layers - 1 else None

            # Fully unrolled recurrence (T is small and static).
            for t in range(T):
                gates = gx_all[t * B:(t + 1) * B] + jnp.dot(
                    h, whh, preferred_element_type=jnp.float32)

                # Single full-width tanh (EUP); i/f/o recovered via 0.5*tanh+0.5 thanks to
                # the 0.5 pre-scaled weight columns, g taken directly.
                th = jnp.tanh(gates)
                sig = 0.5 * th[:, :S] + 0.5
                i_g = sig[:, 0 * DH:1 * DH]
                f_g = sig[:, 1 * DH:2 * DH]
                o_g = sig[:, 2 * DH:3 * DH]
                g_g = th[:, S:]

                c = f_g * c + i_g * g_g
                h = o_g * jnp.tanh(c)

                if t == 0:
                    h_first = h
                if h_steps is not None:
                    h_steps.append(h)

            if layer < num_layers - 1:
                # Layer output at time t: forward half of step t, backward half of step
                # T-1-t.  One lane-masked select over the whole (T*B, DH) slab.
                h_fwd = jnp.concatenate(h_steps, axis=0)
                if D == 2:
                    h_bwd = jnp.concatenate(h_steps[::-1], axis=0)
                    seq = jnp.where(fwd_mask_h, h_fwd, h_bwd)
                else:
                    seq = h_fwd
            else:
                # out[:, -1, :]: forward half from the last step, backward half from step 0.
                if D == 2:
                    last = jnp.where(fwd_mask_h, h, h_first)
                else:
                    last = h

        # Final fully-connected layer fused into the epilogue.
        out_ref[...] = (
            jnp.dot(last, w_fc_ref[...], preferred_element_type=jnp.float32)
            + b_fc_ref[...]
        )

    return kernel


def _full_spec(shape):
    n = len(shape)
    return pl.BlockSpec(shape, lambda *_: (0,) * n)


# ------------------------------------------------------------------- one-time weight packing

def _pack_layer_weights_np(layer_params, H, D):
    """Pack per-direction PyTorch-layout LSTM weights (numpy, runs once at init)."""
    in_sz = int(layer_params[0][0].shape[1])
    DH = D * H

    # W_ih: (4H, in) per direction -> reorder gates to (i,f,o,g), pre-scale i/f/o by 0.5,
    # layout columns as (gate, direction, unit) -> (in, 4*D*H).
    w_ih_stack = np.stack(
        [np.asarray(p[0], np.float32).reshape(4, H, in_sz)[_GATE_PERM]
         for p in layer_params], axis=1)                                # (4, D, H, in)
    w_ih_stack = w_ih_stack * _GATE_SCALE[:, None, None, None]
    w_ih_all = np.transpose(w_ih_stack, (3, 0, 1, 2)).reshape(in_sz, 4 * DH)

    # Combined bias (b_ih + b_hh) with the same reorder + scale.
    b_stack = np.stack(
        [np.asarray(p[2] + p[3], np.float32).reshape(4, H)[_GATE_PERM]
         for p in layer_params], axis=1)                                # (4, D, H)
    b_stack = b_stack * _GATE_SCALE[:, None, None]
    b_all = b_stack.reshape(1, 4 * DH)

    # Block-diagonal recurrent weights: rows [d*H:(d+1)*H] only feed direction-d columns.
    whh_bd = np.zeros((DH, 4 * DH), np.float32)
    whh_view = whh_bd.reshape(DH, 4, D, H)
    for d, p in enumerate(layer_params):
        w_hh = np.asarray(p[1], np.float32).reshape(4, H, H)[_GATE_PERM]  # (4, H_m, H_j)
        w_hh = w_hh * _GATE_SCALE[:, None, None]
        whh_view[d * H:(d + 1) * H, :, d, :] = np.transpose(w_hh, (2, 0, 1))

    return w_ih_all, whh_bd, b_all


def pack_params(params, hidden_size, num_layers, bidirectional):
    """Pack all weights ONCE (outside the per-call path). Returns a flat tuple of arrays."""
    D = 2 if bidirectional else 1
    packed = []
    for layer in range(num_layers):
        layer_params = [params["lstm"][(layer, d)] for d in range(D)]
        packed += list(_pack_layer_weights_np(layer_params, hidden_size, D))
    w_fc, b_fc = params["fc"]
    O = int(w_fc.shape[0])
    packed.append(np.ascontiguousarray(np.asarray(w_fc, np.float32).T))
    packed.append(np.asarray(b_fc, np.float32).reshape(1, O))
    return tuple(jnp.asarray(p) for p in packed)


# ----------------------------------------------------------------------------- public wrapper

@partial(jax.jit, static_argnames=("hidden_size", "num_layers", "bidirectional"))
def series_lstm_forward(x, packed, *, hidden_size, num_layers, bidirectional):
    """x: (B, T, input_size), batch-first like the PyTorch module.  Returns (B, output_size)."""
    B, T, I = x.shape
    H = hidden_size
    D = 2 if bidirectional else 1
    O = packed[-1].shape[-1]

    # Time-major, flattened rows (fused into the same jitted dispatch as the kernel).
    x_tm = jnp.transpose(x, (1, 0, 2)).reshape(T * B, I).astype(jnp.float32)

    args = (x_tm,) + tuple(packed)
    kernel = _make_fused_kernel(T, B, H, D, num_layers)
    return pl.pallas_call(
        kernel,
        out_shape=jax.ShapeDtypeStruct((B, O), jnp.float32),
        in_specs=[_full_spec(a.shape) for a in args],
        out_specs=_full_spec((B, O)),
    )(*args)


# ----------------------------------------------------------------------------- params & reference

def init_params(key, input_size, hidden_size, num_layers, bidirectional, output_size):
    """Deterministic init mirroring nn.LSTM / nn.Linear parameter shapes (PyTorch layout)."""
    D = 2 if bidirectional else 1
    k = 1.0 / math.sqrt(hidden_size)
    lstm = {}
    for layer in range(num_layers):
        in_sz = input_size if layer == 0 else D * hidden_size
        for d in range(D):
            key, k1, k2, k3, k4 = jax.random.split(key, 5)
            lstm[(layer, d)] = (
                jax.random.uniform(k1, (4 * hidden_size, in_sz), jnp.float32, -k, k),
                jax.random.uniform(k2, (4 * hidden_size, hidden_size), jnp.float32, -k, k),
                jax.random.uniform(k3, (4 * hidden_size,), jnp.float32, -k, k),
                jax.random.uniform(k4, (4 * hidden_size,), jnp.float32, -k, k),
            )
    key, kf1, kf2 = jax.random.split(key, 3)
    kf = 1.0 / math.sqrt(D * hidden_size)
    w_fc = jax.random.uniform(kf1, (output_size, D * hidden_size), jnp.float32, -kf, kf)
    b_fc = jax.random.uniform(kf2, (output_size,), jnp.float32, -kf, kf)
    return {"lstm": lstm, "fc": (w_fc, b_fc)}


def series_lstm_reference(x, params, hidden_size, num_layers, bidirectional):
    """Pure-JAX (non-Pallas) reference of the same forward pass (PyTorch semantics)."""
    D = 2 if bidirectional else 1
    B, T, _ = x.shape
    inp = jnp.transpose(x, (1, 0, 2)).astype(jnp.float32)  # (T, B, F)

    def cell(x_t, h, c, w_ih, w_hh, b_ih, b_hh):
        g = x_t @ w_ih.T + h @ w_hh.T + b_ih + b_hh
        H = hidden_size
        i = jax.nn.sigmoid(g[:, :H])
        f = jax.nn.sigmoid(g[:, H:2 * H])
        gg = jnp.tanh(g[:, 2 * H:3 * H])
        o = jax.nn.sigmoid(g[:, 3 * H:])
        c = f * c + i * gg
        h = o * jnp.tanh(c)
        return h, c

    for layer in range(num_layers):
        outs = []
        for d in range(D):
            w_ih, w_hh, b_ih, b_hh = params["lstm"][(layer, d)]
            xi = inp if d == 0 else jnp.flip(inp, axis=0)
            h = jnp.zeros((B, hidden_size), jnp.float32)
            c = jnp.zeros((B, hidden_size), jnp.float32)
            hs = []
            for t in range(T):
                h, c = cell(xi[t], h, c, w_ih, w_hh, b_ih, b_hh)
                hs.append(h)
            h_seq = jnp.stack(hs, axis=0)
            if d == 1:
                h_seq = jnp.flip(h_seq, axis=0)
            outs.append(h_seq)
        inp = jnp.concatenate(outs, axis=-1)

    last = inp[-1]
    w_fc, b_fc = params["fc"]
    return last @ w_fc.T + b_fc


# ----------------------------------------------------------------------------- main

if __name__ == "__main__":
    input_size = 16
    hidden_size = 32
    num_layers = 2
    bidirectional = True
    output_size = 8

    batch, seq = 2, 8  # x is (batch, seq, input_size), batch_first=True

    key = jax.random.PRNGKey(0)
    key, pkey, xkey = jax.random.split(key, 3)
    params = init_params(pkey, input_size, hidden_size, num_layers, bidirectional, output_size)

    # One-time packing (gate reorder, 0.5 pre-scale, block-diagonal W_hh, fc transpose):
    # NOT in the per-call path.
    packed = pack_params(params, hidden_size, num_layers, bidirectional)

    x = jax.random.normal(xkey, (batch, seq, input_size), jnp.float32)

    out = series_lstm_forward(
        x, packed,
        hidden_size=hidden_size, num_layers=num_layers, bidirectional=bidirectional)
    out = jax.block_until_ready(out)
    assert out.shape == (batch, output_size), out.shape

    ref = jax.block_until_ready(
        series_lstm_reference(x, params, hidden_size, num_layers, bidirectional))
    np.testing.assert_allclose(np.asarray(out), np.asarray(ref), rtol=1e-5, atol=3e-5)

    print("KERNEL_OK")
</pallas_src>

<mosaic_0001>
module attributes {stable_mosaic.version = 11 : i64} {
  func.func @kernel(%arg0: memref<16x16xf32, #tpu.memory_space<vmem>>, %arg1: memref<16x256xf32, #tpu.memory_space<vmem>>, %arg2: memref<64x256xf32, #tpu.memory_space<vmem>>, %arg3: memref<1x256xf32, #tpu.memory_space<vmem>>, %arg4: memref<64x256xf32, #tpu.memory_space<vmem>>, %arg5: memref<64x256xf32, #tpu.memory_space<vmem>>, %arg6: memref<1x256xf32, #tpu.memory_space<vmem>>, %arg7: memref<64x8xf32, #tpu.memory_space<vmem>>, %arg8: memref<1x8xf32, #tpu.memory_space<vmem>>, %arg9: memref<2x8xf32, #tpu.memory_space<vmem>>) attributes {dimension_semantics = [], scalar_prefetch = 0 : i64, scratch_operands = 0 : i64, tpu.core_type = #tpu.core_type<tc>} {
    %0 = tpu.iota {dimensions = array<i32: 1>} : vector<1x256xi32>
    %c64_i32 = arith.constant 64 : i32
    %c0_i32 = arith.constant 0 : i32
    %1 = arith.cmpi eq, %c64_i32, %c0_i32 : i32
    %c1_i32 = arith.constant 1 : i32
    %2 = arith.select %1, %c1_i32, %c64_i32 : i32
    %3 = vector.broadcast %2 : i32 to vector<1x256xi32>
    %4 = arith.remsi %0, %3 : vector<1x256xi32>
    %c0_i32_0 = arith.constant 0 : i32
    %5 = vector.broadcast %c0_i32_0 : i32 to vector<1x256xi32>
    %6 = arith.cmpi ne, %4, %5 : vector<1x256xi32>
    %c0_i32_1 = arith.constant 0 : i32
    %7 = vector.broadcast %c0_i32_1 : i32 to vector<1x256xi32>
    %8 = arith.cmpi slt, %4, %7 : vector<1x256xi32>
    %c0_i32_2 = arith.constant 0 : i32
    %9 = arith.cmpi slt, %2, %c0_i32_2 : i32
    %10 = vector.broadcast %9 : i1 to vector<1x256xi1>
    %11 = vector.broadcast %10 : vector<1x256xi1> to vector<1x256xi1>
    %12 = arith.xori %8, %11 : vector<1x256xi1>
    %13 = arith.andi %12, %6 : vector<1x256xi1>
    %14 = vector.broadcast %2 : i32 to vector<1x256xi32>
    %15 = arith.addi %4, %14 : vector<1x256xi32>
    %16 = arith.select %13, %15, %4 : vector<1x256xi1>, vector<1x256xi32>
    %c32_i32 = arith.constant 32 : i32
    %17 = vector.broadcast %c32_i32 : i32 to vector<1x256xi32>
    %18 = arith.cmpi slt, %16, %17 : vector<1x256xi32>
    %19 = tpu.iota {dimensions = array<i32: 1>} : vector<1x64xi32>
    %c32_i32_3 = arith.constant 32 : i32
    %20 = vector.broadcast %c32_i32_3 : i32 to vector<1x64xi32>
    %21 = arith.cmpi slt, %19, %20 : vector<1x64xi32>
    %c0 = arith.constant 0 : index
    %c0_4 = arith.constant 0 : index
    %22 = vector.load %arg0[%c0, %c0_4] : memref<16x16xf32, #tpu.memory_space<vmem>>, vector<16x16xf32>
    %c0_5 = arith.constant 0 : index
    %c0_6 = arith.constant 0 : index
    %23 = vector.load %arg1[%c0_5, %c0_6] : memref<16x256xf32, #tpu.memory_space<vmem>>, vector<16x256xf32>
    %cst = arith.constant dense<0.000000e+00> : vector<16x256xf32>
    %24 = tpu.matmul %22, %23, %cst {dimension_numbers = #tpu.dot_dimension_numbers<[1], [0], [0], [1], [0, 0, 1, 1], [], []>} : vector<16x16xf32>, vector<16x256xf32>, vector<16x256xf32> -> vector<16x256xf32>
    %c0_7 = arith.constant 0 : index
    %c0_8 = arith.constant 0 : index
    %25 = vector.load %arg3[%c0_7, %c0_8] : memref<1x256xf32, #tpu.memory_space<vmem>>, vector<1x256xf32>
    %26 = vector.broadcast %25 : vector<1x256xf32> to vector<16x256xf32>
    %27 = arith.addf %24, %26 : vector<16x256xf32>
    %28 = vector.extract_strided_slice %27 {offsets = [14, 0], sizes = [2, 256], strides = [1, 1]} : vector<16x256xf32> to vector<2x256xf32>
    %29 = vector.extract_strided_slice %27 {offsets = [12, 0], sizes = [2, 256], strides = [1, 1]} : vector<16x256xf32> to vector<2x256xf32>
    %30 = vector.extract_strided_slice %27 {offsets = [10, 0], sizes = [2, 256], strides = [1, 1]} : vector<16x256xf32> to vector<2x256xf32>
    %31 = vector.extract_strided_slice %27 {offsets = [8, 0], sizes = [2, 256], strides = [1, 1]} : vector<16x256xf32> to vector<2x256xf32>
    %32 = vector.extract_strided_slice %27 {offsets = [6, 0], sizes = [2, 256], strides = [1, 1]} : vector<16x256xf32> to vector<2x256xf32>
    %33 = vector.extract_strided_slice %27 {offsets = [4, 0], sizes = [2, 256], strides = [1, 1]} : vector<16x256xf32> to vector<2x256xf32>
    %34 = vector.extract_strided_slice %27 {offsets = [2, 0], sizes = [2, 256], strides = [1, 1]} : vector<16x256xf32> to vector<2x256xf32>
    %35 = vector.extract_strided_slice %27 {offsets = [0, 0], sizes = [2, 256], strides = [1, 1]} : vector<16x256xf32> to vector<2x256xf32>
    %36 = tpu.concatenate %28, %29, %30, %31, %32, %33, %34, %35 in 0 : vector<2x256xf32>, vector<2x256xf32>, vector<2x256xf32>, vector<2x256xf32>, vector<2x256xf32>, vector<2x256xf32>, vector<2x256xf32>, vector<2x256xf32> -> vector<16x256xf32>
    %37 = vector.shape_cast %18 : vector<1x256xi1> to vector<1x256xi1>
    %38 = vector.broadcast %37 : vector<1x256xi1> to vector<16x256xi1>
    %39 = arith.select %38, %27, %36 : vector<16x256xi1>, vector<16x256xf32>
    %c0_9 = arith.constant 0 : index
    %c0_10 = arith.constant 0 : index
    %40 = vector.load %arg2[%c0_9, %c0_10] : memref<64x256xf32, #tpu.memory_space<vmem>>, vector<64x256xf32>
    %cst_11 = arith.constant 0.000000e+00 : f32
    %41 = vector.broadcast %cst_11 : f32 to vector<2x64xf32>
    %cst_12 = arith.constant 0.000000e+00 : f32
    %42 = vector.broadcast %cst_12 : f32 to vector<2x64xf32>
    %43 = vector.extract_strided_slice %39 {offsets = [0, 0], sizes = [2, 256], strides = [1, 1]} : vector<16x256xf32> to vector<2x256xf32>
    %cst_13 = arith.constant dense<0.000000e+00> : vector<2x256xf32>
    %44 = tpu.matmul %41, %40, %cst_13 {dimension_numbers = #tpu.dot_dimension_numbers<[1], [0], [0], [1], [0, 0, 1, 1], [], []>} : vector<2x64xf32>, vector<64x256xf32>, vector<2x256xf32> -> vector<2x256xf32>
    %45 = arith.addf %43, %44 : vector<2x256xf32>
    %46 = math.tanh %45 : vector<2x256xf32>
    %47 = vector.extract_strided_slice %46 {offsets = [0, 0], sizes = [2, 192], strides = [1, 1]} : vector<2x256xf32> to vector<2x192xf32>
    %cst_14 = arith.constant 5.000000e-01 : f32
    %48 = vector.broadcast %cst_14 : f32 to vector<2x192xf32>
    %49 = arith.mulf %48, %47 : vector<2x192xf32>
    %cst_15 = arith.constant 5.000000e-01 : f32
    %50 = vector.broadcast %cst_15 : f32 to vector<2x192xf32>
    %51 = arith.addf %49, %50 : vector<2x192xf32>
    %52 = vector.extract_strided_slice %51 {offsets = [0, 0], sizes = [2, 64], strides = [1, 1]} : vector<2x192xf32> to vector<2x64xf32>
    %53 = vector.extract_strided_slice %51 {offsets = [0, 64], sizes = [2, 64], strides = [1, 1]} : vector<2x192xf32> to vector<2x64xf32>
    %54 = vector.extract_strided_slice %51 {offsets = [0, 128], sizes = [2, 64], strides = [1, 1]} : vector<2x192xf32> to vector<2x64xf32>
    %55 = vector.extract_strided_slice %46 {offsets = [0, 192], sizes = [2, 64], strides = [1, 1]} : vector<2x256xf32> to vector<2x64xf32>
    %56 = arith.mulf %53, %42 : vector<2x64xf32>
    %57 = arith.mulf %52, %55 : vector<2x64xf32>
    %58 = arith.addf %56, %57 : vector<2x64xf32>
    %59 = math.tanh %58 : vector<2x64xf32>
    %60 = arith.mulf %54, %59 : vector<2x64xf32>
    %61 = vector.extract_strided_slice %39 {offsets = [2, 0], sizes = [2, 256], strides = [1, 1]} : vector<16x256xf32> to vector<2x256xf32>
    %cst_16 = arith.constant dense<0.000000e+00> : vector<2x256xf32>
    %62 = tpu.matmul %60, %40, %cst_16 {dimension_numbers = #tpu.dot_dimension_numbers<[1], [0], [0], [1], [0, 0, 1, 1], [], []>} : vector<2x64xf32>, vector<64x256xf32>, vector<2x256xf32> -> vector<2x256xf32>
    %63 = arith.addf %61, %62 : vector<2x256xf32>
    %64 = math.tanh %63 : vector<2x256xf32>
    %65 = vector.extract_strided_slice %64 {offsets = [0, 0], sizes = [2, 192], strides = [1, 1]} : vector<2x256xf32> to vector<2x192xf32>
    %cst_17 = arith.constant 5.000000e-01 : f32
    %66 = vector.broadcast %cst_17 : f32 to vector<2x192xf32>
    %67 = arith.mulf %66, %65 : vector<2x192xf32>
    %cst_18 = arith.constant 5.000000e-01 : f32
    %68 = vector.broadcast %cst_18 : f32 to vector<2x192xf32>
    %69 = arith.addf %67, %68 : vector<2x192xf32>
    %70 = vector.extract_strided_slice %69 {offsets = [0, 0], sizes = [2, 64], strides = [1, 1]} : vector<2x192xf32> to vector<2x64xf32>
    %71 = vector.extract_strided_slice %69 {offsets = [0, 64], sizes = [2, 64], strides = [1, 1]} : vector<2x192xf32> to vector<2x64xf32>
    %72 = vector.extract_strided_slice %69 {offsets = [0, 128], sizes = [2, 64], strides = [1, 1]} : vector<2x192xf32> to vector<2x64xf32>
    %73 = vector.extract_strided_slice %64 {offsets = [0, 192], sizes = [2, 64], strides = [1, 1]} : vector<2x256xf32> to vector<2x64xf32>
    %74 = arith.mulf %71, %58 : vector<2x64xf32>
    %75 = arith.mulf %70, %73 : vector<2x64xf32>
    %76 = arith.addf %74, %75 : vector<2x64xf32>
    %77 = math.tanh %76 : vector<2x64xf32>
    %78 = arith.mulf %72, %77 : vector<2x64xf32>
    %79 = vector.extract_strided_slice %39 {offsets = [4, 0], sizes = [2, 256], strides = [1, 1]} : vector<16x256xf32> to vector<2x256xf32>
    %cst_19 = arith.constant dense<0.000000e+00> : vector<2x256xf32>
    %80 = tpu.matmul %78, %40, %cst_19 {dimension_numbers = #tpu.dot_dimension_numbers<[1], [0], [0], [1], [0, 0, 1, 1], [], []>} : vector<2x64xf32>, vector<64x256xf32>, vector<2x256xf32> -> vector<2x256xf32>
    %81 = arith.addf %79, %80 : vector<2x256xf32>
    %82 = math.tanh %81 : vector<2x256xf32>
    %83 = vector.extract_strided_slice %82 {offsets = [0, 0], sizes = [2, 192], strides = [1, 1]} : vector<2x256xf32> to vector<2x192xf32>
    %cst_20 = arith.constant 5.000000e-01 : f32
    %84 = vector.broadcast %cst_20 : f32 to vector<2x192xf32>
    %85 = arith.mulf %84, %83 : vector<2x192xf32>
    %cst_21 = arith.constant 5.000000e-01 : f32
    %86 = vector.broadcast %cst_21 : f32 to vector<2x192xf32>
    %87 = arith.addf %85, %86 : vector<2x192xf32>
    %88 = vector.extract_strided_slice %87 {offsets = [0, 0], sizes = [2, 64], strides = [1, 1]} : vector<2x192xf32> to vector<2x64xf32>
    %89 = vector.extract_strided_slice %87 {offsets = [0, 64], sizes = [2, 64], strides = [1, 1]} : vector<2x192xf32> to vector<2x64xf32>
    %90 = vector.extract_strided_slice %87 {offsets = [0, 128], sizes = [2, 64], strides = [1, 1]} : vector<2x192xf32> to vector<2x64xf32>
    %91 = vector.extract_strided_slice %82 {offsets = [0, 192], sizes = [2, 64], strides = [1, 1]} : vector<2x256xf32> to vector<2x64xf32>
    %92 = arith.mulf %89, %76 : vector<2x64xf32>
    %93 = arith.mulf %88, %91 : vector<2x64xf32>
    %94 = arith.addf %92, %93 : vector<2x64xf32>
    %95 = math.tanh %94 : vector<2x64xf32>
    %96 = arith.mulf %90, %95 : vector<2x64xf32>
    %97 = vector.extract_strided_slice %39 {offsets = [6, 0], sizes = [2, 256], strides = [1, 1]} : vector<16x256xf32> to vector<2x256xf32>
    %cst_22 = arith.constant dense<0.000000e+00> : vector<2x256xf32>
    %98 = tpu.matmul %96, %40, %cst_22 {dimension_numbers = #tpu.dot_dimension_numbers<[1], [0], [0], [1], [0, 0, 1, 1], [], []>} : vector<2x64xf32>, vector<64x256xf32>, vector<2x256xf32> -> vector<2x256xf32>
    %99 = arith.addf %97, %98 : vector<2x256xf32>
    %100 = math.tanh %99 : vector<2x256xf32>
    %101 = vector.extract_strided_slice %100 {offsets = [0, 0], sizes = [2, 192], strides = [1, 1]} : vector<2x256xf32> to vector<2x192xf32>
    %cst_23 = arith.constant 5.000000e-01 : f32
    %102 = vector.broadcast %cst_23 : f32 to vector<2x192xf32>
    %103 = arith.mulf %102, %101 : vector<2x192xf32>
    %cst_24 = arith.constant 5.000000e-01 : f32
    %104 = vector.broadcast %cst_24 : f32 to vector<2x192xf32>
    %105 = arith.addf %103, %104 : vector<2x192xf32>
    %106 = vector.extract_strided_slice %105 {offsets = [0, 0], sizes = [2, 64], strides = [1, 1]} : vector<2x192xf32> to vector<2x64xf32>
    %107 = vector.extract_strided_slice %105 {offsets = [0, 64], sizes = [2, 64], strides = [1, 1]} : vector<2x192xf32> to vector<2x64xf32>
    %108 = vector.extract_strided_slice %105 {offsets = [0, 128], sizes = [2, 64], strides = [1, 1]} : vector<2x192xf32> to vector<2x64xf32>
    %109 = vector.extract_strided_slice %100 {offsets = [0, 192], sizes = [2, 64], strides = [1, 1]} : vector<2x256xf32> to vector<2x64xf32>
    %110 = arith.mulf %107, %94 : vector<2x64xf32>
    %111 = arith.mulf %106, %109 : vector<2x64xf32>
    %112 = arith.addf %110, %111 : vector<2x64xf32>
    %113 = math.tanh %112 : vector<2x64xf32>
    %114 = arith.mulf %108, %113 : vector<2x64xf32>
    %115 = vector.extract_strided_slice %39 {offsets = [8, 0], sizes = [2, 256], strides = [1, 1]} : vector<16x256xf32> to vector<2x256xf32>
    %cst_25 = arith.constant dense<0.000000e+00> : vector<2x256xf32>
    %116 = tpu.matmul %114, %40, %cst_25 {dimension_numbers = #tpu.dot_dimension_numbers<[1], [0], [0], [1], [0, 0, 1, 1], [], []>} : vector<2x64xf32>, vector<64x256xf32>, vector<2x256xf32> -> vector<2x256xf32>
    %117 = arith.addf %115, %116 : vector<2x256xf32>
    %118 = math.tanh %117 : vector<2x256xf32>
    %119 = vector.extract_strided_slice %118 {offsets = [0, 0], sizes = [2, 192], strides = [1, 1]} : vector<2x256xf32> to vector<2x192xf32>
    %cst_26 = arith.constant 5.000000e-01 : f32
    %120 = vector.broadcast %cst_26 : f32 to vector<2x192xf32>
    %121 = arith.mulf %120, %119 : vector<2x192xf32>
    %cst_27 = arith.constant 5.000000e-01 : f32
    %122 = vector.broadcast %cst_27 : f32 to vector<2x192xf32>
    %123 = arith.addf %121, %122 : vector<2x192xf32>
    %124 = vector.extract_strided_slice %123 {offsets = [0, 0], sizes = [2, 64], strides = [1, 1]} : vector<2x192xf32> to vector<2x64xf32>
    %125 = vector.extract_strided_slice %123 {offsets = [0, 64], sizes = [2, 64], strides = [1, 1]} : vector<2x192xf32> to vector<2x64xf32>
    %126 = vector.extract_strided_slice %123 {offsets = [0, 128], sizes = [2, 64], strides = [1, 1]} : vector<2x192xf32> to vector<2x64xf32>
    %127 = vector.extract_strided_slice %118 {offsets = [0, 192], sizes = [2, 64], strides = [1, 1]} : vector<2x256xf32> to vector<2x64xf32>
    %128 = arith.mulf %125, %112 : vector<2x64xf32>
    %129 = arith.mulf %124, %127 : vector<2x64xf32>
    %130 = arith.addf %128, %129 : vector<2x64xf32>
    %131 = math.tanh %130 : vector<2x64xf32>
    %132 = arith.mulf %126, %131 : vector<2x64xf32>
    %133 = vector.extract_strided_slice %39 {offsets = [10, 0], sizes = [2, 256], strides = [1, 1]} : vector<16x256xf32> to vector<2x256xf32>
    %cst_28 = arith.constant dense<0.000000e+00> : vector<2x256xf32>
    %134 = tpu.matmul %132, %40, %cst_28 {dimension_numbers = #tpu.dot_dimension_numbers<[1], [0], [0], [1], [0, 0, 1, 1], [], []>} : vector<2x64xf32>, vector<64x256xf32>, vector<2x256xf32> -> vector<2x256xf32>
    %135 = arith.addf %133, %134 : vector<2x256xf32>
    %136 = math.tanh %135 : vector<2x256xf32>
    %137 = vector.extract_strided_slice %136 {offsets = [0, 0], sizes = [2, 192], strides = [1, 1]} : vector<2x256xf32> to vector<2x192xf32>
    %cst_29 = arith.constant 5.000000e-01 : f32
    %138 = vector.broadcast %cst_29 : f32 to vector<2x192xf32>
    %139 = arith.mulf %138, %137 : vector<2x192xf32>
    %cst_30 = arith.constant 5.000000e-01 : f32
    %140 = vector.broadcast %cst_30 : f32 to vector<2x192xf32>
    %141 = arith.addf %139, %140 : vector<2x192xf32>
    %142 = vector.extract_strided_slice %141 {offsets = [0, 0], sizes = [2, 64], strides = [1, 1]} : vector<2x192xf32> to vector<2x64xf32>
    %143 = vector.extract_strided_slice %141 {offsets = [0, 64], sizes = [2, 64], strides = [1, 1]} : vector<2x192xf32> to vector<2x64xf32>
    %144 = vector.extract_strided_slice %141 {offsets = [0, 128], sizes = [2, 64], strides = [1, 1]} : vector<2x192xf32> to vector<2x64xf32>
    %145 = vector.extract_strided_slice %136 {offsets = [0, 192], sizes = [2, 64], strides = [1, 1]} : vector<2x256xf32> to vector<2x64xf32>
    %146 = arith.mulf %143, %130 : vector<2x64xf32>
    %147 = arith.mulf %142, %145 : vector<2x64xf32>
    %148 = arith.addf %146, %147 : vector<2x64xf32>
    %149 = math.tanh %148 : vector<2x64xf32>
    %150 = arith.mulf %144, %149 : vector<2x64xf32>
    %151 = vector.extract_strided_slice %39 {offsets = [12, 0], sizes = [2, 256], strides = [1, 1]} : vector<16x256xf32> to vector<2x256xf32>
    %cst_31 = arith.constant dense<0.000000e+00> : vector<2x256xf32>
    %152 = tpu.matmul %150, %40, %cst_31 {dimension_numbers = #tpu.dot_dimension_numbers<[1], [0], [0], [1], [0, 0, 1, 1], [], []>} : vector<2x64xf32>, vector<64x256xf32>, vector<2x256xf32> -> vector<2x256xf32>
    %153 = arith.addf %151, %152 : vector<2x256xf32>
    %154 = math.tanh %153 : vector<2x256xf32>
    %155 = vector.extract_strided_slice %154 {offsets = [0, 0], sizes = [2, 192], strides = [1, 1]} : vector<2x256xf32> to vector<2x192xf32>
    %cst_32 = arith.constant 5.000000e-01 : f32
    %156 = vector.broadcast %cst_32 : f32 to vector<2x192xf32>
    %157 = arith.mulf %156, %155 : vector<2x192xf32>
    %cst_33 = arith.constant 5.000000e-01 : f32
    %158 = vector.broadcast %cst_33 : f32 to vector<2x192xf32>
    %159 = arith.addf %157, %158 : vector<2x192xf32>
    %160 = vector.extract_strided_slice %159 {offsets = [0, 0], sizes = [2, 64], strides = [1, 1]} : vector<2x192xf32> to vector<2x64xf32>
    %161 = vector.extract_strided_slice %159 {offsets = [0, 64], sizes = [2, 64], strides = [1, 1]} : vector<2x192xf32> to vector<2x64xf32>
    %162 = vector.extract_strided_slice %159 {offsets = [0, 128], sizes = [2, 64], strides = [1, 1]} : vector<2x192xf32> to vector<2x64xf32>
    %163 = vector.extract_strided_slice %154 {offsets = [0, 192], sizes = [2, 64], strides = [1, 1]} : vector<2x256xf32> to vector<2x64xf32>
    %164 = arith.mulf %161, %148 : vector<2x64xf32>
    %165 = arith.mulf %160, %163 : vector<2x64xf32>
    %166 = arith.addf %164, %165 : vector<2x64xf32>
    %167 = math.tanh %166 : vector<2x64xf32>
    %168 = arith.mulf %162, %167 : vector<2x64xf32>
    %169 = vector.extract_strided_slice %39 {offsets = [14, 0], sizes = [2, 256], strides = [1, 1]} : vector<16x256xf32> to vector<2x256xf32>
    %cst_34 = arith.constant dense<0.000000e+00> : vector<2x256xf32>
    %170 = tpu.matmul %168, %40, %cst_34 {dimension_numbers = #tpu.dot_dimension_numbers<[1], [0], [0], [1], [0, 0, 1, 1], [], []>} : vector<2x64xf32>, vector<64x256xf32>, vector<2x256xf32> -> vector<2x256xf32>
    %171 = arith.addf %169, %170 : vector<2x256xf32>
    %172 = math.tanh %171 : vector<2x256xf32>
    %173 = vector.extract_strided_slice %172 {offsets = [0, 0], sizes = [2, 192], strides = [1, 1]} : vector<2x256xf32> to vector<2x192xf32>
    %cst_35 = arith.constant 5.000000e-01 : f32
    %174 = vector.broadcast %cst_35 : f32 to vector<2x192xf32>
    %175 = arith.mulf %174, %173 : vector<2x192xf32>
    %cst_36 = arith.constant 5.000000e-01 : f32
    %176 = vector.broadcast %cst_36 : f32 to vector<2x192xf32>
    %177 = arith.addf %175, %176 : vector<2x192xf32>
    %178 = vector.extract_strided_slice %177 {offsets = [0, 0], sizes = [2, 64], strides = [1, 1]} : vector<2x192xf32> to vector<2x64xf32>
    %179 = vector.extract_strided_slice %177 {offsets = [0, 64], sizes = [2, 64], strides = [1, 1]} : vector<2x192xf32> to vector<2x64xf32>
    %180 = vector.extract_strided_slice %177 {offsets = [0, 128], sizes = [2, 64], strides = [1, 1]} : vector<2x192xf32> to vector<2x64xf32>
    %181 = vector.extract_strided_slice %172 {offsets = [0, 192], sizes = [2, 64], strides = [1, 1]} : vector<2x256xf32> to vector<2x64xf32>
    %182 = arith.mulf %179, %166 : vector<2x64xf32>
    %183 = arith.mulf %178, %181 : vector<2x64xf32>
    %184 = arith.addf %182, %183 : vector<2x64xf32>
    %185 = math.tanh %184 : vector<2x64xf32>
    %186 = arith.mulf %180, %185 : vector<2x64xf32>
    %187 = tpu.concatenate %60, %78, %96, %114, %132, %150, %168, %186 in 0 : vector<2x64xf32>, vector<2x64xf32>, vector<2x64xf32>, vector<2x64xf32>, vector<2x64xf32>, vector<2x64xf32>, vector<2x64xf32>, vector<2x64xf32> -> vector<16x64xf32>
    %188 = tpu.concatenate %186, %168, %150, %132, %114, %96, %78, %60 in 0 : vector<2x64xf32>, vector<2x64xf32>, vector<2x64xf32>, vector<2x64xf32>, vector<2x64xf32>, vector<2x64xf32>, vector<2x64xf32>, vector<2x64xf32> -> vector<16x64xf32>
    %189 = vector.shape_cast %21 : vector<1x64xi1> to vector<1x64xi1>
    %190 = vector.broadcast %189 : vector<1x64xi1> to vector<16x64xi1>
    %191 = arith.select %190, %187, %188 : vector<16x64xi1>, vector<16x64xf32>
    %c0_37 = arith.constant 0 : index
    %c0_38 = arith.constant 0 : index
    %192 = vector.load %arg4[%c0_37, %c0_38] : memref<64x256xf32, #tpu.memory_space<vmem>>, vector<64x256xf32>
    %cst_39 = arith.constant dense<0.000000e+00> : vector<16x256xf32>
    %193 = tpu.matmul %191, %192, %cst_39 {dimension_numbers = #tpu.dot_dimension_numbers<[1], [0], [0], [1], [0, 0, 1, 1], [], []>} : vector<16x64xf32>, vector<64x256xf32>, vector<16x256xf32> -> vector<16x256xf32>
    %c0_40 = arith.constant 0 : index
    %c0_41 = arith.constant 0 : index
    %194 = vector.load %arg6[%c0_40, %c0_41] : memref<1x256xf32, #tpu.memory_space<vmem>>, vector<1x256xf32>
    %195 = vector.broadcast %194 : vector<1x256xf32> to vector<16x256xf32>
    %196 = arith.addf %193, %195 : vector<16x256xf32>
    %197 = vector.extract_strided_slice %196 {offsets = [14, 0], sizes = [2, 256], strides = [1, 1]} : vector<16x256xf32> to vector<2x256xf32>
    %198 = vector.extract_strided_slice %196 {offsets = [12, 0], sizes = [2, 256], strides = [1, 1]} : vector<16x256xf32> to vector<2x256xf32>
    %199 = vector.extract_strided_slice %196 {offsets = [10, 0], sizes = [2, 256], strides = [1, 1]} : vector<16x256xf32> to vector<2x256xf32>
    %200 = vector.extract_strided_slice %196 {offsets = [8, 0], sizes = [2, 256], strides = [1, 1]} : vector<16x256xf32> to vector<2x256xf32>
    %201 = vector.extract_strided_slice %196 {offsets = [6, 0], sizes = [2, 256], strides = [1, 1]} : vector<16x256xf32> to vector<2x256xf32>
    %202 = vector.extract_strided_slice %196 {offsets = [4, 0], sizes = [2, 256], strides = [1, 1]} : vector<16x256xf32> to vector<2x256xf32>
    %203 = vector.extract_strided_slice %196 {offsets = [2, 0], sizes = [2, 256], strides = [1, 1]} : vector<16x256xf32> to vector<2x256xf32>
    %204 = vector.extract_strided_slice %196 {offsets = [0, 0], sizes = [2, 256], strides = [1, 1]} : vector<16x256xf32> to vector<2x256xf32>
    %205 = tpu.concatenate %197, %198, %199, %200, %201, %202, %203, %204 in 0 : vector<2x256xf32>, vector<2x256xf32>, vector<2x256xf32>, vector<2x256xf32>, vector<2x256xf32>, vector<2x256xf32>, vector<2x256xf32>, vector<2x256xf32> -> vector<16x256xf32>
    %206 = vector.shape_cast %18 : vector<1x256xi1> to vector<1x256xi1>
    %207 = vector.broadcast %206 : vector<1x256xi1> to vector<16x256xi1>
    %208 = arith.select %207, %196, %205 : vector<16x256xi1>, vector<16x256xf32>
    %c0_42 = arith.constant 0 : index
    %c0_43 = arith.constant 0 : index
    %209 = vector.load %arg5[%c0_42, %c0_43] : memref<64x256xf32, #tpu.memory_space<vmem>>, vector<64x256xf32>
    %cst_44 = arith.constant 0.000000e+00 : f32
    %210 = vector.broadcast %cst_44 : f32 to vector<2x64xf32>
    %cst_45 = arith.constant 0.000000e+00 : f32
    %211 = vector.broadcast %cst_45 : f32 to vector<2x64xf32>
    %212 = vector.extract_strided_slice %208 {offsets = [0, 0], sizes = [2, 256], strides = [1, 1]} : vector<16x256xf32> to vector<2x256xf32>
    %cst_46 = arith.constant dense<0.000000e+00> : vector<2x256xf32>
    %213 = tpu.matmul %210, %209, %cst_46 {dimension_numbers = #tpu.dot_dimension_numbers<[1], [0], [0], [1], [0, 0, 1, 1], [], []>} : vector<2x64xf32>, vector<64x256xf32>, vector<2x256xf32> -> vector<2x256xf32>
    %214 = arith.addf %212, %213 : vector<2x256xf32>
    %215 = math.tanh %214 : vector<2x256xf32>
    %216 = vector.extract_strided_slice %215 {offsets = [0, 0], sizes = [2, 192], strides = [1, 1]} : vector<2x256xf32> to vector<2x192xf32>
    %cst_47 = arith.constant 5.000000e-01 : f32
    %217 = vector.broadcast %cst_47 : f32 to vector<2x192xf32>
    %218 = arith.mulf %217, %216 : vector<2x192xf32>
    %cst_48 = arith.constant 5.000000e-01 : f32
    %219 = vector.broadcast %cst_48 : f32 to vector<2x192xf32>
    %220 = arith.addf %218, %219 : vector<2x192xf32>
    %221 = vector.extract_strided_slice %220 {offsets = [0, 0], sizes = [2, 64], strides = [1, 1]} : vector<2x192xf32> to vector<2x64xf32>
    %222 = vector.extract_strided_slice %220 {offsets = [0, 64], sizes = [2, 64], strides = [1, 1]} : vector<2x192xf32> to vector<2x64xf32>
    %223 = vector.extract_strided_slice %220 {offsets = [0, 128], sizes = [2, 64], strides = [1, 1]} : vector<2x192xf32> to vector<2x64xf32>
    %224 = vector.extract_strided_slice %215 {offsets = [0, 192], sizes = [2, 64], strides = [1, 1]} : vector<2x256xf32> to vector<2x64xf32>
    %225 = arith.mulf %222, %211 : vector<2x64xf32>
    %226 = arith.mulf %221, %224 : vector<2x64xf32>
    %227 = arith.addf %225, %226 : vector<2x64xf32>
    %228 = math.tanh %227 : vector<2x64xf32>
    %229 = arith.mulf %223, %228 : vector<2x64xf32>
    %230 = vector.extract_strided_slice %208 {offsets = [2, 0], sizes = [2, 256], strides = [1, 1]} : vector<16x256xf32> to vector<2x256xf32>
    %cst_49 = arith.constant dense<0.000000e+00> : vector<2x256xf32>
    %231 = tpu.matmul %229, %209, %cst_49 {dimension_numbers = #tpu.dot_dimension_numbers<[1], [0], [0], [1], [0, 0, 1, 1], [], []>} : vector<2x64xf32>, vector<64x256xf32>, vector<2x256xf32> -> vector<2x256xf32>
    %232 = arith.addf %230, %231 : vector<2x256xf32>
    %233 = math.tanh %232 : vector<2x256xf32>
    %234 = vector.extract_strided_slice %233 {offsets = [0, 0], sizes = [2, 192], strides = [1, 1]} : vector<2x256xf32> to vector<2x192xf32>
    %cst_50 = arith.constant 5.000000e-01 : f32
    %235 = vector.broadcast %cst_50 : f32 to vector<2x192xf32>
    %236 = arith.mulf %235, %234 : vector<2x192xf32>
    %cst_51 = arith.constant 5.000000e-01 : f32
    %237 = vector.broadcast %cst_51 : f32 to vector<2x192xf32>
    %238 = arith.addf %236, %237 : vector<2x192xf32>
    %239 = vector.extract_strided_slice %238 {offsets = [0, 0], sizes = [2, 64], strides = [1, 1]} : vector<2x192xf32> to vector<2x64xf32>
    %240 = vector.extract_strided_slice %238 {offsets = [0, 64], sizes = [2, 64], strides = [1, 1]} : vector<2x192xf32> to vector<2x64xf32>
    %241 = vector.extract_strided_slice %238 {offsets = [0, 128], sizes = [2, 64], strides = [1, 1]} : vector<2x192xf32> to vector<2x64xf32>
    %242 = vector.extract_strided_slice %233 {offsets = [0, 192], sizes = [2, 64], strides = [1, 1]} : vector<2x256xf32> to vector<2x64xf32>
    %243 = arith.mulf %240, %227 : vector<2x64xf32>
    %244 = arith.mulf %239, %242 : vector<2x64xf32>
    %245 = arith.addf %243, %244 : vector<2x64xf32>
    %246 = math.tanh %245 : vector<2x64xf32>
    %247 = arith.mulf %241, %246 : vector<2x64xf32>
    %248 = vector.extract_strided_slice %208 {offsets = [4, 0], sizes = [2, 256], strides = [1, 1]} : vector<16x256xf32> to vector<2x256xf32>
    %cst_52 = arith.constant dense<0.000000e+00> : vector<2x256xf32>
    %249 = tpu.matmul %247, %209, %cst_52 {dimension_numbers = #tpu.dot_dimension_numbers<[1], [0], [0], [1], [0, 0, 1, 1], [], []>} : vector<2x64xf32>, vector<64x256xf32>, vector<2x256xf32> -> vector<2x256xf32>
    %250 = arith.addf %248, %249 : vector<2x256xf32>
    %251 = math.tanh %250 : vector<2x256xf32>
    %252 = vector.extract_strided_slice %251 {offsets = [0, 0], sizes = [2, 192], strides = [1, 1]} : vector<2x256xf32> to vector<2x192xf32>
    %cst_53 = arith.constant 5.000000e-01 : f32
    %253 = vector.broadcast %cst_53 : f32 to vector<2x192xf32>
    %254 = arith.mulf %253, %252 : vector<2x192xf32>
    %cst_54 = arith.constant 5.000000e-01 : f32
    %255 = vector.broadcast %cst_54 : f32 to vector<2x192xf32>
    %256 = arith.addf %254, %255 : vector<2x192xf32>
    %257 = vector.extract_strided_slice %256 {offsets = [0, 0], sizes = [2, 64], strides = [1, 1]} : vector<2x192xf32> to vector<2x64xf32>
    %258 = vector.extract_strided_slice %256 {offsets = [0, 64], sizes = [2, 64], strides = [1, 1]} : vector<2x192xf32> to vector<2x64xf32>
    %259 = vector.extract_strided_slice %256 {offsets = [0, 128], sizes = [2, 64], strides = [1, 1]} : vector<2x192xf32> to vector<2x64xf32>
    %260 = vector.extract_strided_slice %251 {offsets = [0, 192], sizes = [2, 64], strides = [1, 1]} : vector<2x256xf32> to vector<2x64xf32>
    %261 = arith.mulf %258, %245 : vector<2x64xf32>
    %262 = arith.mulf %257, %260 : vector<2x64xf32>
    %263 = arith.addf %261, %262 : vector<2x64xf32>
    %264 = math.tanh %263 : vector<2x64xf32>
    %265 = arith.mulf %259, %264 : vector<2x64xf32>
    %266 = vector.extract_strided_slice %208 {offsets = [6, 0], sizes = [2, 256], strides = [1, 1]} : vector<16x256xf32> to vector<2x256xf32>
    %cst_55 = arith.constant dense<0.000000e+00> : vector<2x256xf32>
    %267 = tpu.matmul %265, %209, %cst_55 {dimension_numbers = #tpu.dot_dimension_numbers<[1], [0], [0], [1], [0, 0, 1, 1], [], []>} : vector<2x64xf32>, vector<64x256xf32>, vector<2x256xf32> -> vector<2x256xf32>
    %268 = arith.addf %266, %267 : vector<2x256xf32>
    %269 = math.tanh %268 : vector<2x256xf32>
    %270 = vector.extract_strided_slice %269 {offsets = [0, 0], sizes = [2, 192], strides = [1, 1]} : vector<2x256xf32> to vector<2x192xf32>
    %cst_56 = arith.constant 5.000000e-01 : f32
    %271 = vector.broadcast %cst_56 : f32 to vector<2x192xf32>
    %272 = arith.mulf %271, %270 : vector<2x192xf32>
    %cst_57 = arith.constant 5.000000e-01 : f32
    %273 = vector.broadcast %cst_57 : f32 to vector<2x192xf32>
    %274 = arith.addf %272, %273 : vector<2x192xf32>
    %275 = vector.extract_strided_slice %274 {offsets = [0, 0], sizes = [2, 64], strides = [1, 1]} : vector<2x192xf32> to vector<2x64xf32>
    %276 = vector.extract_strided_slice %274 {offsets = [0, 64], sizes = [2, 64], strides = [1, 1]} : vector<2x192xf32> to vector<2x64xf32>
    %277 = vector.extract_strided_slice %274 {offsets = [0, 128], sizes = [2, 64], strides = [1, 1]} : vector<2x192xf32> to vector<2x64xf32>
    %278 = vector.extract_strided_slice %269 {offsets = [0, 192], sizes = [2, 64], strides = [1, 1]} : vector<2x256xf32> to vector<2x64xf32>
    %279 = arith.mulf %276, %263 : vector<2x64xf32>
    %280 = arith.mulf %275, %278 : vector<2x64xf32>
    %281 = arith.addf %279, %280 : vector<2x64xf32>
    %282 = math.tanh %281 : vector<2x64xf32>
    %283 = arith.mulf %277, %282 : vector<2x64xf32>
    %284 = vector.extract_strided_slice %208 {offsets = [8, 0], sizes = [2, 256], strides = [1, 1]} : vector<16x256xf32> to vector<2x256xf32>
    %cst_58 = arith.constant dense<0.000000e+00> : vector<2x256xf32>
    %285 = tpu.matmul %283, %209, %cst_58 {dimension_numbers = #tpu.dot_dimension_numbers<[1], [0], [0], [1], [0, 0, 1, 1], [], []>} : vector<2x64xf32>, vector<64x256xf32>, vector<2x256xf32> -> vector<2x256xf32>
    %286 = arith.addf %284, %285 : vector<2x256xf32>
    %287 = math.tanh %286 : vector<2x256xf32>
    %288 = vector.extract_strided_slice %287 {offsets = [0, 0], sizes = [2, 192], strides = [1, 1]} : vector<2x256xf32> to vector<2x192xf32>
    %cst_59 = arith.constant 5.000000e-01 : f32
    %289 = vector.broadcast %cst_59 : f32 to vector<2x192xf32>
    %290 = arith.mulf %289, %288 : vector<2x192xf32>
    %cst_60 = arith.constant 5.000000e-01 : f32
    %291 = vector.broadcast %cst_60 : f32 to vector<2x192xf32>
    %292 = arith.addf %290, %291 : vector<2x192xf32>
    %293 = vector.extract_strided_slice %292 {offsets = [0, 0], sizes = [2, 64], strides = [1, 1]} : vector<2x192xf32> to vector<2x64xf32>
    %294 = vector.extract_strided_slice %292 {offsets = [0, 64], sizes = [2, 64], strides = [1, 1]} : vector<2x192xf32> to vector<2x64xf32>
    %295 = vector.extract_strided_slice %292 {offsets = [0, 128], sizes = [2, 64], strides = [1, 1]} : vector<2x192xf32> to vector<2x64xf32>
    %296 = vector.extract_strided_slice %287 {offsets = [0, 192], sizes = [2, 64], strides = [1, 1]} : vector<2x256xf32> to vector<2x64xf32>
    %297 = arith.mulf %294, %281 : vector<2x64xf32>
    %298 = arith.mulf %293, %296 : vector<2x64xf32>
    %299 = arith.addf %297, %298 : vector<2x64xf32>
    %300 = math.tanh %299 : vector<2x64xf32>
    %301 = arith.mulf %295, %300 : vector<2x64xf32>
    %302 = vector.extract_strided_slice %208 {offsets = [10, 0], sizes = [2, 256], strides = [1, 1]} : vector<16x256xf32> to vector<2x256xf32>
    %cst_61 = arith.constant dense<0.000000e+00> : vector<2x256xf32>
    %303 = tpu.matmul %301, %209, %cst_61 {dimension_numbers = #tpu.dot_dimension_numbers<[1], [0], [0], [1], [0, 0, 1, 1], [], []>} : vector<2x64xf32>, vector<64x256xf32>, vector<2x256xf32> -> vector<2x256xf32>
    %304 = arith.addf %302, %303 : vector<2x256xf32>
    %305 = math.tanh %304 : vector<2x256xf32>
    %306 = vector.extract_strided_slice %305 {offsets = [0, 0], sizes = [2, 192], strides = [1, 1]} : vector<2x256xf32> to vector<2x192xf32>
    %cst_62 = arith.constant 5.000000e-01 : f32
    %307 = vector.broadcast %cst_62 : f32 to vector<2x192xf32>
    %308 = arith.mulf %307, %306 : vector<2x192xf32>
    %cst_63 = arith.constant 5.000000e-01 : f32
    %309 = vector.broadcast %cst_63 : f32 to vector<2x192xf32>
    %310 = arith.addf %308, %309 : vector<2x192xf32>
    %311 = vector.extract_strided_slice %310 {offsets = [0, 0], sizes = [2, 64], strides = [1, 1]} : vector<2x192xf32> to vector<2x64xf32>
    %312 = vector.extract_strided_slice %310 {offsets = [0, 64], sizes = [2, 64], strides = [1, 1]} : vector<2x192xf32> to vector<2x64xf32>
    %313 = vector.extract_strided_slice %310 {offsets = [0, 128], sizes = [2, 64], strides = [1, 1]} : vector<2x192xf32> to vector<2x64xf32>
    %314 = vector.extract_strided_slice %305 {offsets = [0, 192], sizes = [2, 64], strides = [1, 1]} : vector<2x256xf32> to vector<2x64xf32>
    %315 = arith.mulf %312, %299 : vector<2x64xf32>
    %316 = arith.mulf %311, %314 : vector<2x64xf32>
    %317 = arith.addf %315, %316 : vector<2x64xf32>
    %318 = math.tanh %317 : vector<2x64xf32>
    %319 = arith.mulf %313, %318 : vector<2x64xf32>
    %320 = vector.extract_strided_slice %208 {offsets = [12, 0], sizes = [2, 256], strides = [1, 1]} : vector<16x256xf32> to vector<2x256xf32>
    %cst_64 = arith.constant dense<0.000000e+00> : vector<2x256xf32>
    %321 = tpu.matmul %319, %209, %cst_64 {dimension_numbers = #tpu.dot_dimension_numbers<[1], [0], [0], [1], [0, 0, 1, 1], [], []>} : vector<2x64xf32>, vector<64x256xf32>, vector<2x256xf32> -> vector<2x256xf32>
    %322 = arith.addf %320, %321 : vector<2x256xf32>
    %323 = math.tanh %322 : vector<2x256xf32>
    %324 = vector.extract_strided_slice %323 {offsets = [0, 0], sizes = [2, 192], strides = [1, 1]} : vector<2x256xf32> to vector<2x192xf32>
    %cst_65 = arith.constant 5.000000e-01 : f32
    %325 = vector.broadcast %cst_65 : f32 to vector<2x192xf32>
    %326 = arith.mulf %325, %324 : vector<2x192xf32>
    %cst_66 = arith.constant 5.000000e-01 : f32
    %327 = vector.broadcast %cst_66 : f32 to vector<2x192xf32>
    %328 = arith.addf %326, %327 : vector<2x192xf32>
    %329 = vector.extract_strided_slice %328 {offsets = [0, 0], sizes = [2, 64], strides = [1, 1]} : vector<2x192xf32> to vector<2x64xf32>
    %330 = vector.extract_strided_slice %328 {offsets = [0, 64], sizes = [2, 64], strides = [1, 1]} : vector<2x192xf32> to vector<2x64xf32>
    %331 = vector.extract_strided_slice %328 {offsets = [0, 128], sizes = [2, 64], strides = [1, 1]} : vector<2x192xf32> to vector<2x64xf32>
    %332 = vector.extract_strided_slice %323 {offsets = [0, 192], sizes = [2, 64], strides = [1, 1]} : vector<2x256xf32> to vector<2x64xf32>
    %333 = arith.mulf %330, %317 : vector<2x64xf32>
    %334 = arith.mulf %329, %332 : vector<2x64xf32>
    %335 = arith.addf %333, %334 : vector<2x64xf32>
    %336 = math.tanh %335 : vector<2x64xf32>
    %337 = arith.mulf %331, %336 : vector<2x64xf32>
    %338 = vector.extract_strided_slice %208 {offsets = [14, 0], sizes = [2, 256], strides = [1, 1]} : vector<16x256xf32> to vector<2x256xf32>
    %cst_67 = arith.constant dense<0.000000e+00> : vector<2x256xf32>
    %339 = tpu.matmul %337, %209, %cst_67 {dimension_numbers = #tpu.dot_dimension_numbers<[1], [0], [0], [1], [0, 0, 1, 1], [], []>} : vector<2x64xf32>, vector<64x256xf32>, vector<2x256xf32> -> vector<2x256xf32>
    %340 = arith.addf %338, %339 : vector<2x256xf32>
    %341 = math.tanh %340 : vector<2x256xf32>
    %342 = vector.extract_strided_slice %341 {offsets = [0, 0], sizes = [2, 192], strides = [1, 1]} : vector<2x256xf32> to vector<2x192xf32>
    %cst_68 = arith.constant 5.000000e-01 : f32
    %343 = vector.broadcast %cst_68 : f32 to vector<2x192xf32>
    %344 = arith.mulf %343, %342 : vector<2x192xf32>
    %cst_69 = arith.constant 5.000000e-01 : f32
    %345 = vector.broadcast %cst_69 : f32 to vector<2x192xf32>
    %346 = arith.addf %344, %345 : vector<2x192xf32>
    %347 = vector.extract_strided_slice %346 {offsets = [0, 0], sizes = [2, 64], strides = [1, 1]} : vector<2x192xf32> to vector<2x64xf32>
    %348 = vector.extract_strided_slice %346 {offsets = [0, 64], sizes = [2, 64], strides = [1, 1]} : vector<2x192xf32> to vector<2x64xf32>
    %349 = vector.extract_strided_slice %346 {offsets = [0, 128], sizes = [2, 64], strides = [1, 1]} : vector<2x192xf32> to vector<2x64xf32>
    %350 = vector.extract_strided_slice %341 {offsets = [0, 192], sizes = [2, 64], strides = [1, 1]} : vector<2x256xf32> to vector<2x64xf32>
    %351 = arith.mulf %348, %335 : vector<2x64xf32>
    %352 = arith.mulf %347, %350 : vector<2x64xf32>
    %353 = arith.addf %351, %352 : vector<2x64xf32>
    %354 = math.tanh %353 : vector<2x64xf32>
    %355 = arith.mulf %349, %354 : vector<2x64xf32>
    %356 = vector.shape_cast %21 : vector<1x64xi1> to vector<1x64xi1>
    %357 = vector.broadcast %356 : vector<1x64xi1> to vector<2x64xi1>
    %358 = arith.select %357, %355, %229 : vector<2x64xi1>, vector<2x64xf32>
    %c0_70 = arith.constant 0 : index
    %c0_71 = arith.constant 0 : index
    %359 = vector.load %arg7[%c0_70, %c0_71] : memref<64x8xf32, #tpu.memory_space<vmem>>, vector<64x8xf32>
    %cst_72 = arith.constant dense<0.000000e+00> : vector<2x8xf32>
    %360 = tpu.matmul %358, %359, %cst_72 {dimension_numbers = #tpu.dot_dimension_numbers<[1], [0], [0], [1], [0, 0, 1, 1], [], []>} : vector<2x64xf32>, vector<64x8xf32>, vector<2x8xf32> -> vector<2x8xf32>
    %c0_73 = arith.constant 0 : index
    %c0_74 = arith.constant 0 : index
    %361 = vector.load %arg8[%c0_73, %c0_74] : memref<1x8xf32, #tpu.memory_space<vmem>>, vector<1x8xf32>
    %362 = vector.broadcast %361 : vector<1x8xf32> to vector<2x8xf32>
    %363 = arith.addf %360, %362 : vector<2x8xf32>
    %c0_75 = arith.constant 0 : index
    %c0_76 = arith.constant 0 : index
    %364 = vector.load %arg9[%c0_75, %c0_76] : memref<2x8xf32, #tpu.memory_space<vmem>>, vector<2x8xf32>
    tpu.vector_store %arg9[%c0_75, %c0_76], %363 {strides = array<i32>} : memref<2x8xf32, #tpu.memory_space<vmem>>, vector<2x8xf32>,
    return
  }
}

</mosaic_0001>

<bundles_post_ra>
// kernel: series_lstm_forward.1
= control target key start
LH: loop header
LB: loop body
LE: loop exit
PB: predicated region body
PF: predicated region fallthrough
CT: control target
= control target key end

     0   :  { %14 = vsyncpa [#allocation3], 0  ;;  %s3494_s0 = inlined_call_operand.vmem [shape: f32[16,16], index: 0, kind: input, shape index: {}]   ;;  %s3495_s1 = inlined_call_operand.hbm [shape: f32[16,256], index: 1, kind: input, shape index: {}]   ;;  %s3496_s2 = inlined_call_operand.hbm [shape: f32[64,256], index: 2, kind: input, shape index: {}]   ;;  %s3497_s3 = inlined_call_operand.vmem [shape: f32[1,256], index: 3, kind: input, shape index: {}]   ;;  %s3498_s4 = inlined_call_operand.hbm [shape: f32[64,256], index: 4, kind: input, shape index: {}]   ;;  %s3499_s5 = inlined_call_operand.vmem [shape: f32[64,256], index: 5, kind: input, shape index: {}]   ;;  %s3500_s6 = inlined_call_operand.hbm [shape: f32[1,256], index: 6, kind: input, shape index: {}]   ;;  %s3501_s7 = inlined_call_operand.vmem [shape: f32[64,8], index: 7, kind: input, shape index: {}]   ;;  %s3502_s8 = inlined_call_operand.vmem [shape: f32[1,8], index: 8, kind: input, shape index: {}]   ;;  %s3503_s9 = inlined_call_operand.hbm [shape: f32[2,8], index: 9, kind: output, shape index: {}]  }
   0x1   :  { %15 = vsyncpa [#allocation6], 0 }
   0x2   :  { %16 = vsyncpa [#allocation9], 0 }
   0x3   :  { %17 = vsyncpa [#allocation4], 0  ;;  %s2850_s30 = smov [#allocation5]   ;;  %s2851_s11 = smov [#allocation2]  }
   0x4   :  { %s37_s10 = sshll.u32 %s2850_s30, 4  ;;  %s25_s12 = sshll.u32 %s2851_s11, 4  ;;  %s38_s10 = int_to_ptr.vmem [resolvable:$true] %s37_s10  ;;  %s2911_s12 = int_to_ptr.vmem [resolvable:$true] %s25_s12 }
   0x5   :  { %s2732_s15 = scalar_lea.hbm %s3496_s2, 2048 }
   0x6   :  { %p2733_p0 = scmp.ne.s32.totalorder %s3496_s2, %s2732_s15  ;;  %p2736_p1 = scmp.lt.u32.totalorder %s2732_s15, %s3496_s2 }
   0x8   :  { %p2738_p2 = pnand %p2736_p1, %p2733_p0 }
   0xa   :  { %2741 = shalt.err (!%p2738_p2)
}
   0xb   :  { %s2742_s20 = scalar_lea.vmem %s38_s10, 2048  ;;  %p2747_p4 = scmp.lt.s32.totalorder %s38_s10, %s38_s10 }
   0xc   :  { %p2743_p3 = scmp.ne.s32.totalorder %s38_s10, %s2742_s20  ;;  %p2748_p5 = scmp.lt.s32.totalorder %s2742_s20, %s2742_s20 }
   0xe   :  { %p2749_p6 = por %p2748_p5, %p2747_p4 }
  0x10   :  { %p2750_p7 = pnand %p2749_p6, %p2743_p3 }
  0x12   :  { %2753 = shalt.err (!%p2750_p7)
}
  0x13   :  { %s2852_s21 = smov 256   ;;  %s2853_s22 = smov 16  }
  0x14   :  { %43 = dma.hbm_to_vmem [thread:$0]  %s3496_s2, 2048, %s38_s10, [#allocation6], %s2852_s21, %s2852_s21, %s2853_s22  }
  0x15   :  { %s2754_s27 = scalar_lea.hbm %s3495_s1, 512 }
  0x16   :  { %p2755_p8 = scmp.ne.s32.totalorder %s3495_s1, %s2754_s27  ;;  %p2758_p9 = scmp.lt.u32.totalorder %s2754_s27, %s3495_s1 }
  0x18   :  { %p2760_p10 = pnand %p2758_p9, %p2755_p8 }
  0x1a   :  { %2763 = shalt.err (!%p2760_p10)
}
  0x1b   :  { %s2764_s13 = scalar_lea.vmem %s2911_s12, 512  ;;  %p2769_p12 = scmp.lt.s32.totalorder %s2911_s12, %s2911_s12 }
  0x1c   :  { %p2765_p11 = scmp.ne.s32.totalorder %s2911_s12, %s2764_s13  ;;  %p2770_p13 = scmp.lt.s32.totalorder %s2764_s13, %s2764_s13 }
  0x1e   :  { %p2771_p0 = por %p2770_p13, %p2769_p12 }
  0x20   :  { %p2772_p1 = pnand %p2771_p0, %p2765_p11 }
  0x22   :  { %2775 = shalt.err (!%p2772_p1)
}
  0x23   :  { %31 = dma.hbm_to_vmem [thread:$0]  %s3495_s1, 512, %s2911_s12, [#allocation3], %s2852_s21, %s2852_s21, %s2853_s22  }
  0x24   :  { %s2854_s14 = smov [#allocation7]   ;;  %s2855_s16 = smov [#allocation8]  }
  0x25   :  { %s51_s15 = sshll.u32 %s2854_s14, 4  ;;  %s66_s17 = sshll.u32 %s2855_s16, 4  ;;  %s52_s15 = int_to_ptr.vmem [resolvable:$true] %s51_s15  ;;  %s67_s17 = int_to_ptr.vmem [resolvable:$true] %s66_s17 }
  0x26   :  { %s2776_s20 = scalar_lea.hbm %s3498_s4, 2048 }
  0x27   :  { %p2777_p2 = scmp.ne.s32.totalorder %s3498_s4, %s2776_s20  ;;  %p2780_p3 = scmp.lt.u32.totalorder %s2776_s20, %s3498_s4 }
  0x29   :  { %p2782_p4 = pnand %p2780_p3, %p2777_p2 }
  0x2b   :  { %2785 = shalt.err (!%p2782_p4)
}
  0x2c   :  { %s2786_s1 = scalar_lea.vmem %s52_s15, 2048  ;;  %p2791_p6 = scmp.lt.s32.totalorder %s52_s15, %s52_s15 }
  0x2d   :  { %p2787_p5 = scmp.ne.s32.totalorder %s52_s15, %s2786_s1  ;;  %p2792_p7 = scmp.lt.s32.totalorder %s2786_s1, %s2786_s1 }
  0x2f   :  { %p2793_p8 = por %p2792_p7, %p2791_p6 }
  0x31   :  { %p2794_p9 = pnand %p2793_p8, %p2787_p5 }
  0x33   :  { %2797 = shalt.err (!%p2794_p9)
}
  0x34   :  { %57 = dma.hbm_to_vmem [thread:$0]  %s3498_s4, 2048, %s52_s15, [#allocation6], %s2852_s21, %s2852_s21, %s2853_s22  }
  0x35   :  { %s2798_s30 = scalar_lea.hbm %s3500_s6, 32 }
  0x36   :  { %p2799_p10 = scmp.ne.s32.totalorder %s3500_s6, %s2798_s30  ;;  %p2802_p11 = scmp.lt.u32.totalorder %s2798_s30, %s3500_s6 }
  0x38   :  { %p2804_p12 = pnand %p2802_p11, %p2799_p10 }
  0x3a   :  { %2807 = shalt.err (!%p2804_p12)
}
  0x3b   :  { %s2808_s14 = scalar_lea.vmem %s67_s17, 32  ;;  %p2813_p0 = scmp.lt.s32.totalorder %s67_s17, %s67_s17 }
  0x3c   :  { %p2809_p13 = scmp.ne.s32.totalorder %s67_s17, %s2808_s14  ;;  %p2814_p1 = scmp.lt.s32.totalorder %s2808_s14, %s2808_s14 }
  0x3e   :  { %p2815_p2 = por %p2814_p1, %p2813_p0 }
  0x40   :  { %p2816_p3 = pnand %p2815_p2, %p2809_p13 }
  0x42   :  { %2819 = shalt.err (!%p2816_p3)
}
  0x43   :  { %69 = dma.hbm_to_vmem [thread:$0]  %s3500_s6, 32, %s67_s17, [#allocation9]  }
  0x44   :  { %2842 = dma.done.wait [#allocation3], 512  }
  0x45   :  { %2843 = vsyncadd [#allocation3], 4294966784 }
  0x46   :  { %2844 = dma.done.wait [#allocation6], 4096  }
  0x47   :  { %2845 = vsyncadd [#allocation6], 4294963200 }
  0x48   :  { %2846 = dma.done.wait [#allocation9], 32  }
  0x49   :  { %2847 = vsyncadd [#allocation9], 4294967264  ;;  %v2856_v0 = vmov 0.0   ;;  %v119_v1 = vld [vmem:[#allocation2 + $0x8] sm:$0xff]  ;;  %v121_v2 = vld [vmem:[#allocation2 + $0x18] sm:$0xff]  ;;  %vm134_vm0 = vcmask 130048   ;;  %v86_v33 = vlaneseq }
  0x4a   :  { %205 = vmatprep.mubr.f32.mxu0 %v2856_v0  ;;  %345 = vmatprep.mubr.f32.mxu1 %v2856_v0  ;;  %v262_v3 = vld [vmem:[#allocation5 + $0x8] sm:$0xff]  ;;  %v2337_v4 = vpack.c.bf16 %v121_v2, %v119_v1  ;;  %v264_v5 = vld [vmem:[#allocation5 + $0x18] sm:$0xff]  ;;  %v118_v6 = vld [vmem:[#allocation2] sm:$0xff]  ;;  %vm238_vm1 = vcmask 1041408   ;;  %vm241_vm2 = vcmask 1043456   ;;  %vm244_vm3 = vcmask 1045504  }
  0x4b   :  { %v120_v7 = vld [vmem:[#allocation2 + $0x10] sm:$0xff]  ;;  %v2977_v8 = vpack.c.bf16 %v264_v5, %v262_v3  ;;  %v261_v10 = vld [vmem:[#allocation5] sm:$0xff]  ;;  %v266_v13 = vld [vmem:[#allocation5 + $0x28] sm:$0xff]  ;;  %v3031_v34 = vshrl.u32 %v86_v33, 7  ;;  %v3034_v36 = vand.u32 127, %v86_v33  ;;  %vm277_vm6 = vcmask 523264  }
  0x4c   :  { %v2339_v9 = vpack.c.bf16 %v120_v7, %v118_v6  ;;  %v263_v11 = vld [vmem:[#allocation5 + $0x10] sm:$0xff]  ;;  %2338 = vmatprep.subr.bf16.mxu0 %v2337_v4  ;;  %v268_v14 = vld [vmem:[#allocation5 + $0x38] sm:$0xff]  ;;  %v265_v15 = vld [vmem:[#allocation5 + $0x20] sm:$0xff]  ;;  %vm2859_vm8 = vmmov 0   ;;  %s2860_s15 = smov [#allocation10]   ;;  %vm2270_vm9 = vcmask 58368  }
  0x4d   :  { %v2979_v12 = vpack.c.bf16 %v263_v11, %v261_v10  ;;  %2342 = vmatprep.subr.bf16.mxu1 %v2977_v8  ;;  %v116_v16 = vld [vmem:[%s3494_s0] sm:$0xff]  ;;  %v2985_v17 = vpack.c.bf16 %v268_v14, %v266_v13  ;;  %v267_v18 = vld [vmem:[#allocation5 + $0x30] sm:$0xff]  ;;  %v270_v19 = vld [vmem:[#allocation5 + $0x48] sm:$0xff]  ;;  %v126_v35 = vsub.s32 0, %v3031_v34  ;;  %v130_v38 = vsub.s32 1, %v3031_v34  ;;  %s2278_s16 = sshll.u32 %s2860_s15, 4  ;;  %s2279_s16 = int_to_ptr.vmem [resolvable:$true] %s2278_s16 }
  0x4e   :  { %2340 = vmatpush1.bf16.msra.mxu0 %v2339_v9  ;;  %v2988_v20 = vpack.c.bf16 %v267_v18, %v265_v15  ;;  %v272_v21 = vld [vmem:[#allocation5 + $0x58] sm:$0xff]  ;;  %v269_v23 = vld [vmem:[#allocation5 + $0x40] sm:$0xff]  ;;  %v271_v24 = vld [vmem:[#allocation5 + $0x50] sm:$0xff]  ;;  %v88_v41 = vadd.s32 128, %v3034_v36  ;;  %v93_v45 = vand.u32 63, %v3034_v36  ;;  %vm115_vm7 = vcmp.lt.s32.totalorder %v3034_v36, 32  ;;  %p2825_p5 = scmp.lt.s32.totalorder %s2279_s16, %s2279_s16 }
  0x4f   :  { %2344 = vmatpush1.bf16.msra.mxu1 %v2979_v12  ;;  %2358 = vmatprep.subr.bf16.mxu0 %v2977_v8  ;;  %v2992_v22 = vpack.c.bf16 %v272_v21, %v270_v19  ;;  %v274_v25 = vld [vmem:[#allocation5 + $0x68] sm:$0xff]  ;;  %v276_v26 = vld [vmem:[#allocation5 + $0x78] sm:$0xff]  ;;  %v3001_v28 = vpack.c.bf16 %v271_v24, %v269_v23  ;;  %v273_v30 = vld [vmem:[#allocation5 + $0x60] sm:$0xff] }
  0x50   :  { %2346 = vmatprep.subr.bf16.mxu1 %v2985_v17  ;;  %v117_v27 = vld [vmem:[%s3494_s0 + $0x8] sm:$0xff]  ;;  %v3005_v29 = vpack.c.bf16 %v276_v26, %v274_v25  ;;  %v275_v31 = vld [vmem:[#allocation5 + $0x70] sm:$0xff]  ;;  %v122_v37 = vld [vmem:[%s3497_s3] sm:$0x3]  ;;  %v100_v47 = vand.u32 63, %v88_v41  ;;  %vm3047_vm4 = vcmp.lt.s32.totalorder %v93_v45, 32 }
  0x51   :  { %2289 = vmatmul.mubr.msk.f32.vlgmr.msra.gmra.mrb[0].mxu0 %vm134_vm0, %v116_v16  ;;  %v3011_v32 = vpack.c.bf16 %v275_v31, %v273_v30  ;;  %v127_v39 = vrot.slane %v122_v37, %v126_v35  ;;  %v131_v40 = vrot.slane %v122_v37, %v130_v38  ;;  %s2857_s3 = smov 64  }
  0x52   :  { %211 = vmatprep.mubr.f32.mxu0 %v2856_v0  ;;  %2360 = vmatpush1.bf16.msra.mxu0 %v2979_v12  ;;  %vm3052_vm5 = vcmp.lt.s32.totalorder %v100_v47, 32 }
  0x53   :  { %2348 = vmatpush1.bf16.msra.mxu1 %v2988_v20  ;;  %2362 = vmatprep.subr.bf16.mxu0 %v2985_v17 }
  0x54   :  { %2350 = vmatprep.subr.bf16.mxu1 %v2992_v22 }
  0x55   :  { %2290 = vmatmul.mubr.msk.f32.gmra.mrb[2].mxu0 %vm134_vm0, %v117_v27 }
  0x56   :  { %2364 = vmatpush1.bf16.msra.mxu0 %v2988_v20  ;;  %444 = vmatprep.mubr.f32.mxu0 %v2856_v0 }
  0x57   :  { %2352 = vmatpush1.bf16.msra.mxu1 %v3001_v28  ;;  %2366 = vmatprep.subr.bf16.mxu0 %v2992_v22 }
  0x58   :  { %2354 = vmatprep.subr.bf16.mxu1 %v3005_v29 }
  0x5a   :  { %2368 = vmatpush1.bf16.msra.mxu0 %v3001_v28 }
  0x5b   :  { %2356 = vmatpush1.bf16.msra.mxu1 %v3011_v32  ;;  %2370 = vmatprep.subr.bf16.mxu0 %v3005_v29 }
  0x5c   :  { %2374 = vmatprep.subr.bf16.mxu1 %v2977_v8 }
  0x5e   :  { %346 = vmatmul.mubr.f32.vlgmr.msra.gmra.mrb[0].mxu1 %v2856_v0  ;;  %2372 = vmatpush1.bf16.msra.mxu0 %v3011_v32 }
  0x5f   :  { %2376 = vmatpush1.bf16.msra.mxu1 %v2979_v12  ;;  %553 = vmatprep.mubr.f32.mxu1 %v2856_v0 }
  0x60   :  { %2378 = vmatprep.subr.bf16.mxu1 %v2985_v17  ;;  %2390 = vmatprep.subr.bf16.mxu0 %v2977_v8 }
  0x63   :  { %2380 = vmatpush1.bf16.msra.mxu1 %v2988_v20 }
  0x64   :  { %2382 = vmatprep.subr.bf16.mxu1 %v2992_v22 }
  0x67   :  { %2384 = vmatpush1.bf16.msra.mxu1 %v3001_v28 }
  0x68   :  { %2386 = vmatprep.subr.bf16.mxu1 %v3005_v29 }
  0x6b   :  { %2388 = vmatpush1.bf16.msra.mxu1 %v3011_v32 }
  0x6c   :  { %2406 = vmatprep.subr.bf16.mxu1 %v2977_v8 }
 0x124   :  { %v207_v42 = vpop.f32.mrb[0].mxu0 }
 0x125   :  { %v208_v43 = vadd.f32 %v207_v42, %v127_v39  ;;  %v209_v44 = vpop.f32.mrb[1].mxu0 }
 0x126   :  { %v210_v46 = vadd.f32 %v209_v44, %v131_v40 }
 0x127   :  { %v230_v48 = vrot.slane %v208_v43, 6  ;;  %v234_v49 = vrot.slane %v208_v43, 2 }
 0x128   :  { %v231_v50 = vrot.slane %v210_v46, 6  ;;  %v235_v51 = vrot.slane %v210_v46, 2  ;;  %v213_v52 = vpop.f32.mrb[2].mxu0 }
 0x129   :  { %v247_v53 = vsel %vm238_vm1, %v230_v48, %v234_v49  ;;  %v214_v54 = vadd.f32 %v213_v52, %v127_v39  ;;  %v215_v55 = vpop.f32.mrb[3].mxu0 }
 0x12a   :  { %v248_v57 = vsel %vm238_vm1, %v231_v50, %v235_v51  ;;  %v216_v58 = vadd.f32 %v215_v55, %v131_v40  ;;  %v249_v60 = vsel %vm241_vm2, %v247_v53, %v230_v48 }
 0x12b   :  { %v220_v61 = vrot.slane %v214_v54, 6  ;;  %v224_v62 = vrot.slane %v214_v54, 2  ;;  %v251_v63 = vsel %vm244_vm3, %v249_v60, %v234_v49  ;;  %v250_v1 = vsel %vm241_vm2, %v248_v57, %v231_v50 }
 0x12c   :  { %v221_v2 = vrot.slane %v216_v58, 6  ;;  %v225_v3 = vrot.slane %v216_v58, 2  ;;  %v3061_v4 = vsel %vm3047_vm4, %v214_v54, %v251_v63  ;;  %v252_v5 = vsel %vm244_vm3, %v250_v1, %v235_v51 }
 0x12d   :  { %v239_v6 = vsel %vm238_vm1, %v220_v61, %v224_v62  ;;  %v3067_v7 = vsel %vm3052_vm5, %v216_v58, %v252_v5 }
 0x12e   :  { %v240_v9 = vsel %vm238_vm1, %v221_v2, %v225_v3  ;;  %v242_v10 = vsel %vm241_vm2, %v239_v6, %v220_v61 }
 0x12f   :  { %v245_v11 = vsel %vm244_vm3, %v242_v10, %v224_v62  ;;  %v243_v13 = vsel %vm241_vm2, %v240_v9, %v221_v2 }
 0x130   :  { %v3075_v14 = vsel %vm3047_vm4, %v208_v43, %v245_v11  ;;  %v246_v15 = vsel %vm244_vm3, %v243_v13, %v225_v3 }
 0x131   :  { %v347_v16 = vpop.f32.mrb[0].mxu1  ;;  %v3080_v18 = vsel %vm3052_vm5, %v210_v46, %v246_v15 }
 0x132   :  { %v349_v19 = vpop.f32.mrb[1].mxu1  ;;  %v352_v24 = vadd.f32 %v347_v16, %v3075_v14 }
 0x133   :  { %v353_v21 = vadd.f32 %v349_v19, %v3080_v18 }
 0x135   :  { %2636 = vtanh.f32 %v353_v21 }
 0x136   :  { %2638 = vtanh.f32 %v352_v24 }
 0x13f   :  { %v2637_v23 = vpop.eup %2636 }
 0x140   :  { %362 = vrot.lane.b32.xlu0 %v2637_v23, %s2857_s3  ;;  %v2639_v25 = vpop.eup %2638  ;;  %v357_v41 = vmul.f32 0.5, %v2637_v23 }
 0x141   :  { %v356_v26 = vmul.f32 0.5, %v2639_v25 }
 0x142   :  { %v359_v42 = vadd.f32 0.5, %v357_v41 }
 0x143   :  { %v358_v27 = vadd.f32 0.5, %v356_v26 }
 0x145   :  { %v360_v33 = vmul.f32 0.0, %v358_v27 }
 0x1b2   :  { %v363_v30 = vpop.permute.xlu0 %362 }
 0x1b3   :  { %v365_v31 = vmul.f32 %v363_v30, %v358_v27 }
 0x1b5   :  { %367 = vrot.lane.b32.xlu0 %v365_v31, %s2857_s3 }
 0x227   :  { %v368_v37 = vpop.permute.xlu0 %367 }
 0x228   :  { %v370_v39 = vadd.f32 %v368_v37, %v360_v33 }
 0x22a   :  { %2640 = vtanh.f32 %v370_v39  ;;  %v466_v58 = vrot.slane %v370_v39, 6 }
 0x234   :  { %v2641_v40 = vpop.eup %2640 }
 0x235   :  { %373 = vrot.lane.b32.xlu1 %v2641_v40, %s2857_s3 }
 0x2a7   :  { %v374_v43 = vpop.permute.xlu1 %373 }
 0x2a8   :  { %v3087_v44 = vmul.f32 %v374_v43, %v359_v42 }
 0x2aa   :  { %2291 = vmatmul.mubr.msk.f32.vlgmr.msra.gmra.mrb[4].mxu0 %vm277_vm6, %v3087_v44 }
 0x2ab   :  { %2392 = vmatpush1.bf16.msra.mxu0 %v2979_v12  ;;  %662 = vmatprep.mubr.f32.mxu0 %v2856_v0 }
 0x2ac   :  { %2394 = vmatprep.subr.bf16.mxu0 %v2985_v17 }
 0x2af   :  { %2396 = vmatpush1.bf16.msra.mxu0 %v2988_v20 }
 0x2b0   :  { %2398 = vmatprep.subr.bf16.mxu0 %v2992_v22 }
 0x2b3   :  { %2400 = vmatpush1.bf16.msra.mxu0 %v3001_v28 }
 0x2b4   :  { %2402 = vmatprep.subr.bf16.mxu0 %v3005_v29 }
 0x2b7   :  { %2404 = vmatpush1.bf16.msra.mxu0 %v3011_v32 }
 0x2b8   :  { %2422 = vmatprep.subr.bf16.mxu0 %v2977_v8 }
 0x37d   :  { %v446_v45 = vpop.f32.mrb[4].mxu0 }
 0x37e   :  { %v448_v46 = vpop.f32.mrb[5].mxu0  ;;  %v453_v50 = vrot.slane %v446_v45, 6 }
 0x37f   :  { %v454_v47 = vrot.slane %v448_v46, 6 }
 0x380   :  { %v457_v51 = vadd.f32 %v453_v50, %v3075_v14 }
 0x381   :  { %v458_v48 = vadd.f32 %v454_v47, %v3080_v18 }
 0x383   :  { %2642 = vtanh.f32 %v458_v48 }
 0x384   :  { %2644 = vtanh.f32 %v457_v51 }
 0x38d   :  { %v2643_v49 = vpop.eup %2642 }
 0x38e   :  { %470 = vrot.lane.b32.xlu1 %v2643_v49, %s2857_s3  ;;  %v2645_v52 = vpop.eup %2644  ;;  %v462_v1 = vmul.f32 0.5, %v2643_v49 }
 0x38f   :  { %v461_v53 = vmul.f32 0.5, %v2645_v52 }
 0x390   :  { %v464_v2 = vadd.f32 0.5, %v462_v1 }
 0x391   :  { %v463_v54 = vadd.f32 0.5, %v461_v53 }
 0x393   :  { %v468_v60 = vmul.f32 %v466_v58, %v463_v54 }
 0x400   :  { %v471_v55 = vpop.permute.xlu1 %470 }
 0x401   :  { %v473_v57 = vmul.f32 %v471_v55, %v463_v54 }
 0x403   :  { %475 = vrot.lane.b32.xlu0 %v473_v57, %s2857_s3 }
 0x475   :  { %v476_v61 = vpop.permute.xlu0 %475 }
 0x476   :  { %v478_v62 = vadd.f32 %v476_v61, %v468_v60 }
 0x478   :  { %2646 = vtanh.f32 %v478_v62  ;;  %v575_v27 = vrot.slane %v478_v62, 6 }
 0x482   :  { %v2647_v63 = vpop.eup %2646 }
 0x483   :  { %481 = vrot.lane.b32.xlu1 %v2647_v63, %s2857_s3 }
 0x4f5   :  { %v482_v3 = vpop.permute.xlu1 %481 }
 0x4f6   :  { %v3105_v5 = vmul.f32 %v482_v3, %v464_v2 }
 0x4f8   :  { %v486_v6 = vrot.slane %v3105_v5, 2  ;;  %v1132_v43 = vsel %vm238_vm1, %v3087_v44, %v3105_v5 }
 0x4fa   :  { %2292 = vmatmul.mubr.msk.f32.vlgmr.msra.gmra.mrb[2].mxu1 %vm277_vm6, %v486_v6 }
 0x4fb   :  { %2408 = vmatpush1.bf16.msra.mxu1 %v2979_v12  ;;  %771 = vmatprep.mubr.f32.mxu1 %v2856_v0 }
 0x4fc   :  { %2410 = vmatprep.subr.bf16.mxu1 %v2985_v17 }
 0x4ff   :  { %2412 = vmatpush1.bf16.msra.mxu1 %v2988_v20 }
 0x500   :  { %2414 = vmatprep.subr.bf16.mxu1 %v2992_v22 }
 0x503   :  { %2416 = vmatpush1.bf16.msra.mxu1 %v3001_v28 }
 0x504   :  { %2418 = vmatprep.subr.bf16.mxu1 %v3005_v29 }
 0x507   :  { %2420 = vmatpush1.bf16.msra.mxu1 %v3011_v32 }
 0x508   :  { %2438 = vmatprep.subr.bf16.mxu1 %v2977_v8 }
 0x5cd   :  { %v555_v9 = vpop.f32.mrb[2].mxu1 }
 0x5ce   :  { %v557_v10 = vpop.f32.mrb[3].mxu1  ;;  %v562_v16 = vrot.slane %v555_v9, 4 }
 0x5cf   :  { %v563_v11 = vrot.slane %v557_v10, 4 }
 0x5d0   :  { %v566_v19 = vadd.f32 %v562_v16, %v3075_v14 }
 0x5d1   :  { %v567_v13 = vadd.f32 %v563_v11, %v3080_v18  ;;  %v1150_v11 = vrot.slane %v3105_v5, 6 }
 0x5d3   :  { %2648 = vtanh.f32 %v567_v13 }
 0x5d4   :  { %2650 = vtanh.f32 %v566_v19 }
 0x5dd   :  { %v2649_v15 = vpop.eup %2648 }
 0x5de   :  { %579 = vrot.lane.b32.xlu0 %v2649_v15, %s2857_s3  ;;  %v2651_v21 = vpop.eup %2650  ;;  %v571_v39 = vmul.f32 0.5, %v2649_v15 }
 0x5df   :  { %v570_v23 = vmul.f32 0.5, %v2651_v21 }
 0x5e0   :  { %v573_v40 = vadd.f32 0.5, %v571_v39 }
 0x5e1   :  { %v572_v24 = vadd.f32 0.5, %v570_v23 }
 0x5e3   :  { %v577_v30 = vmul.f32 %v575_v27, %v572_v24 }
 0x650   :  { %v580_v25 = vpop.permute.xlu0 %579 }
 0x651   :  { %v582_v26 = vmul.f32 %v580_v25, %v572_v24 }
 0x653   :  { %584 = vrot.lane.b32.xlu1 %v582_v26, %s2857_s3 }
 0x6c5   :  { %v585_v31 = vpop.permute.xlu1 %584 }
 0x6c6   :  { %v587_v33 = vadd.f32 %v585_v31, %v577_v30 }
 0x6c8   :  { %2652 = vtanh.f32 %v587_v33 }
 0x6d2   :  { %v2653_v37 = vpop.eup %2652 }
 0x6d3   :  { %590 = vrot.lane.b32.xlu0 %v2653_v37, %s2857_s3 }
 0x745   :  { %v591_v41 = vpop.permute.xlu0 %590 }
 0x746   :  { %v593_v42 = vmul.f32 %v591_v41, %v573_v40 }
 0x748   :  { %v595_v45 = vrot.slane %v593_v42, 4  ;;  %v1133_v46 = vsel %vm241_vm2, %v1132_v43, %v593_v42  ;;  %v1148_v6 = vrot.slane %v593_v42, 2 }
 0x74a   :  { %2293 = vmatmul.mubr.msk.f32.vlgmr.msra.gmra.mrb[6].mxu0 %vm277_vm6, %v595_v45 }
 0x74b   :  { %2424 = vmatpush1.bf16.msra.mxu0 %v2979_v12  ;;  %873 = vmatprep.mubr.f32.mxu0 %v2856_v0 }
 0x74c   :  { %2426 = vmatprep.subr.bf16.mxu0 %v2985_v17 }
 0x74f   :  { %2428 = vmatpush1.bf16.msra.mxu0 %v2988_v20 }
 0x750   :  { %2430 = vmatprep.subr.bf16.mxu0 %v2992_v22 }
 0x753   :  { %2432 = vmatpush1.bf16.msra.mxu0 %v3001_v28 }
 0x754   :  { %2434 = vmatprep.subr.bf16.mxu0 %v3005_v29 }
 0x757   :  { %2436 = vmatpush1.bf16.msra.mxu0 %v3011_v32 }
 0x758   :  { %2454 = vmatprep.subr.bf16.mxu0 %v2977_v8  ;;  %v684_v8 = vrot.slane %v587_v33, 6 }
 0x81d   :  { %v664_v47 = vpop.f32.mrb[6].mxu0 }
 0x81e   :  { %v666_v48 = vpop.f32.mrb[7].mxu0  ;;  %v671_v52 = vrot.slane %v664_v47, 2 }
 0x81f   :  { %v672_v49 = vrot.slane %v666_v48, 2 }
 0x820   :  { %v675_v53 = vadd.f32 %v671_v52, %v3075_v14 }
 0x821   :  { %v676_v50 = vadd.f32 %v672_v49, %v3080_v18 }
 0x823   :  { %2654 = vtanh.f32 %v676_v50 }
 0x824   :  { %2656 = vtanh.f32 %v675_v53 }
 0x82d   :  { %v2655_v51 = vpop.eup %2654 }
 0x82e   :  { %688 = vrot.lane.b32.xlu1 %v2655_v51, %s2857_s3  ;;  %v2657_v54 = vpop.eup %2656  ;;  %v680_v1 = vmul.f32 0.5, %v2655_v51 }
 0x82f   :  { %v679_v55 = vmul.f32 0.5, %v2657_v54 }
 0x830   :  { %v682_v2 = vadd.f32 0.5, %v680_v1 }
 0x831   :  { %v681_v57 = vadd.f32 0.5, %v679_v55 }
 0x833   :  { %v686_v61 = vmul.f32 %v684_v8, %v681_v57 }
 0x8a0   :  { %v689_v58 = vpop.permute.xlu1 %688 }
 0x8a1   :  { %v691_v60 = vmul.f32 %v689_v58, %v681_v57 }
 0x8a3   :  { %693 = vrot.lane.b32.xlu0 %v691_v60, %s2857_s3 }
 0x915   :  { %v694_v62 = vpop.permute.xlu0 %693 }
 0x916   :  { %v696_v63 = vadd.f32 %v694_v62, %v686_v61 }
 0x918   :  { %2658 = vtanh.f32 %v696_v63  ;;  %v787_v31 = vrot.slane %v696_v63, 6 }
 0x922   :  { %v2659_v18 = vpop.eup %2658 }
 0x923   :  { %699 = vrot.lane.b32.xlu1 %v2659_v18, %s2857_s3 }
 0x995   :  { %v700_v3 = vpop.permute.xlu1 %699 }
 0x996   :  { %v702_v14 = vmul.f32 %v700_v3, %v682_v2 }
 0x998   :  { %v704_v9 = vrot.slane %v702_v14, 6  ;;  %v3143_v10 = vsel %vm244_vm3, %v1133_v46, %v702_v14 }
 0x99a   :  { %v1157_v13 = vsel %vm238_vm1, %v704_v9, %v1148_v6  ;;  %2294 = vmatmul.mubr.msk.f32.vlgmr.msra.gmra.mrb[4].mxu1 %vm277_vm6, %v704_v9 }
 0x99b   :  { %2440 = vmatpush1.bf16.msra.mxu1 %v2979_v12  ;;  %982 = vmatprep.mubr.f32.mxu1 %v2856_v0  ;;  %v3151_v15 = vsel %vm241_vm2, %v1157_v13, %v1150_v11 }
 0x99c   :  { %2442 = vmatprep.subr.bf16.mxu1 %v2985_v17 }
 0x99f   :  { %2444 = vmatpush1.bf16.msra.mxu1 %v2988_v20 }
 0x9a0   :  { %2446 = vmatprep.subr.bf16.mxu1 %v2992_v22 }
 0x9a3   :  { %2448 = vmatpush1.bf16.msra.mxu1 %v3001_v28 }
 0x9a4   :  { %2450 = vmatprep.subr.bf16.mxu1 %v3005_v29 }
 0x9a7   :  { %2452 = vmatpush1.bf16.msra.mxu1 %v3011_v32 }
 0xa6d   :  { %v773_v5 = vpop.f32.mrb[4].mxu1 }
 0xa6e   :  { %v775_v16 = vpop.f32.mrb[5].mxu1  ;;  %v778_v23 = vadd.f32 %v773_v5, %v3061_v4 }
 0xa6f   :  { %v779_v19 = vadd.f32 %v775_v16, %v3067_v7 }
 0xa71   :  { %2660 = vtanh.f32 %v779_v19 }
 0xa72   :  { %2662 = vtanh.f32 %v778_v23 }
 0xa7b   :  { %v2661_v21 = vpop.eup %2660 }
 0xa7c   :  { %791 = vrot.lane.b32.xlu0 %v2661_v21, %s2857_s3  ;;  %v2663_v24 = vpop.eup %2662  ;;  %v783_v41 = vmul.f32 0.5, %v2661_v21 }
 0xa7d   :  { %v782_v25 = vmul.f32 0.5, %v2663_v24 }
 0xa7e   :  { %v785_v42 = vadd.f32 0.5, %v783_v41 }
 0xa7f   :  { %v784_v26 = vadd.f32 0.5, %v782_v25 }
 0xa81   :  { %v789_v33 = vmul.f32 %v787_v31, %v784_v26 }
 0xaee   :  { %v792_v27 = vpop.permute.xlu0 %791 }
 0xaef   :  { %v794_v30 = vmul.f32 %v792_v27, %v784_v26 }
 0xaf1   :  { %796 = vrot.lane.b32.xlu1 %v794_v30, %s2857_s3 }
 0xb63   :  { %v797_v37 = vpop.permute.xlu1 %796 }
 0xb64   :  { %v799_v39 = vadd.f32 %v797_v37, %v789_v33 }
 0xb66   :  { %2664 = vtanh.f32 %v799_v39 }
 0xb70   :  { %v2665_v40 = vpop.eup %2664 }
 0xb71   :  { %802 = vrot.lane.b32.xlu0 %v2665_v40, %s2857_s3 }
 0xbe3   :  { %v803_v43 = vpop.permute.xlu0 %802 }
 0xbe4   :  { %v3164_v45 = vmul.f32 %v803_v43, %v785_v42 }
 0xbe6   :  { %2295 = vmatmul.mubr.msk.f32.vlgmr.msra.gmra.mrb[8].mxu0 %vm277_vm6, %v3164_v45 }
 0xbe7   :  { %2456 = vmatpush1.bf16.msra.mxu0 %v2979_v12  ;;  %1091 = vmatprep.mubr.f32.mxu0 %v2856_v0 }
 0xbe8   :  { %2458 = vmatprep.subr.bf16.mxu0 %v2985_v17 }
 0xbeb   :  { %2460 = vmatpush1.bf16.msra.mxu0 %v2988_v20 }
 0xbec   :  { %2462 = vmatprep.subr.bf16.mxu0 %v2992_v22 }
 0xbef   :  { %2464 = vmatpush1.bf16.msra.mxu0 %v3001_v28 }
 0xbf0   :  { %2466 = vmatprep.subr.bf16.mxu0 %v3005_v29 }
 0xbf3   :  { %2468 = vmatpush1.bf16.msra.mxu0 %v3011_v32  ;;  %v895_v32 = vrot.slane %v799_v39, 6 }
 0xcb9   :  { %v875_v46 = vpop.f32.mrb[8].mxu0 }
 0xcba   :  { %v877_v47 = vpop.f32.mrb[9].mxu0  ;;  %v882_v17 = vrot.slane %v875_v46, 6 }
 0xcbb   :  { %v883_v48 = vrot.slane %v877_v47, 6 }
 0xcbc   :  { %v886_v20 = vadd.f32 %v882_v17, %v3061_v4 }
 0xcbd   :  { %v887_v49 = vadd.f32 %v883_v48, %v3067_v7 }
 0xcbf   :  { %2666 = vtanh.f32 %v887_v49 }
 0xcc0   :  { %2668 = vtanh.f32 %v886_v20 }
 0xcc9   :  { %v2667_v12 = vpop.eup %2666 }
 0xcca   :  { %899 = vrot.lane.b32.xlu1 %v2667_v12, %s2857_s3  ;;  %v2669_v22 = vpop.eup %2668  ;;  %v891_v57 = vmul.f32 0.5, %v2667_v12 }
 0xccb   :  { %v890_v50 = vmul.f32 0.5, %v2669_v22  ;;  %v1165_v22 = vld [vmem:[#allocation7 + $0x8] sm:$0xff] }
 0xccc   :  { %v893_v58 = vadd.f32 0.5, %v891_v57 }
 0xccd   :  { %v892_v28 = vadd.f32 0.5, %v890_v50  ;;  %v1167_v50 = vld [vmem:[#allocation7 + $0x18] sm:$0xff] }
 0xccf   :  { %v897_v52 = vmul.f32 %v895_v32, %v892_v28  ;;  %v1171_v32 = vld [vmem:[#allocation7 + $0x38] sm:$0xff] }
 0xd3c   :  { %v900_v51 = vpop.permute.xlu1 %899 }
 0xd3d   :  { %v902_v29 = vmul.f32 %v900_v51, %v892_v28  ;;  %v2469_v28 = vpack.c.bf16 %v1167_v50, %v1165_v22  ;;  %v1166_v51 = vld [vmem:[#allocation7 + $0x10] sm:$0xff]  ;;  %v1323_v22 = vld [vmem:[%s3499_s5 + $0x60] sm:$0xff] }
 0xd3f   :  { %904 = vrot.lane.b32.xlu0 %v902_v29, %s2857_s3  ;;  %v1169_v29 = vld [vmem:[#allocation7 + $0x28] sm:$0xff]  ;;  %2470 = vmatprep.subr.bf16.mxu1 %v2469_v28 }
 0xdb1   :  { %v905_v53 = vpop.permute.xlu0 %904 }
 0xdb2   :  { %v907_v54 = vadd.f32 %v905_v53, %v897_v52  ;;  %v2473_v53 = vpack.c.bf16 %v1171_v32, %v1169_v29 }
 0xdb4   :  { %2670 = vtanh.f32 %v907_v54  ;;  %v1004_v16 = vrot.slane %v907_v54, 6  ;;  %v1168_v54 = vld [vmem:[#allocation7 + $0x20] sm:$0xff] }
 0xdbe   :  { %v2671_v55 = vpop.eup %2670 }
 0xdbf   :  { %910 = vrot.lane.b32.xlu1 %v2671_v55, %s2857_s3  ;;  %v1170_v55 = vld [vmem:[#allocation7 + $0x30] sm:$0xff] }
 0xe31   :  { %v911_v60 = vpop.permute.xlu1 %910 }
 0xe32   :  { %v3181_v8 = vmul.f32 %v911_v60, %v893_v58  ;;  %v1173_v58 = vld [vmem:[#allocation7 + $0x48] sm:$0xff]  ;;  %v1175_v60 = vld [vmem:[#allocation7 + $0x58] sm:$0xff] }
 0xe34   :  { %v915_v61 = vrot.slane %v3181_v8, 2  ;;  %v1135_v31 = vsel %vm238_vm1, %v3164_v45, %v3181_v8 }
 0xe36   :  { %2296 = vmatmul.mubr.msk.f32.vlgmr.msra.gmra.mrb[6].mxu1 %vm277_vm6, %v915_v61 }
 0xe37   :  { %1262 = vmatprep.mubr.f32.mxu1 %v2856_v0 }
 0xf09   :  { %v984_v62 = vpop.f32.mrb[6].mxu1 }
 0xf0a   :  { %v986_v63 = vpop.f32.mrb[7].mxu1  ;;  %v991_v3 = vrot.slane %v984_v62, 4  ;;  %v2477_v62 = vpack.c.bf16 %v1175_v60, %v1173_v58  ;;  %v1143_v58 = vrot.slane %v3181_v8, 6  ;;  %v1145_v60 = vrot.slane %v3164_v45, 2  ;;  %v1180_v45 = vld [vmem:[#allocation8] sm:$0x3] }
 0xf0b   :  { %v992_v18 = vrot.slane %v986_v63, 4  ;;  %v1172_v63 = vld [vmem:[#allocation7 + $0x40] sm:$0xff]  ;;  %v1185_v8 = vrot.slane %v1180_v45, %v126_v35 }
 0xf0c   :  { %v995_v14 = vadd.f32 %v991_v3, %v3061_v4 }
 0xf0d   :  { %v996_v1 = vadd.f32 %v992_v18, %v3067_v7  ;;  %v1174_v18 = vld [vmem:[#allocation7 + $0x50] sm:$0xff] }
 0xf0f   :  { %2672 = vtanh.f32 %v996_v1 }
 0xf10   :  { %2674 = vtanh.f32 %v995_v14  ;;  %v1312_v14 = vld [vmem:[%s3499_s5 + $0x8] sm:$0xff] }
 0xf19   :  { %v2673_v2 = vpop.eup %2672 }
 0xf1a   :  { %1008 = vrot.lane.b32.xlu0 %v2673_v2, %s2857_s3  ;;  %v2675_v6 = vpop.eup %2674  ;;  %v1000_v25 = vmul.f32 0.5, %v2673_v2  ;;  %v2479_v2 = vpack.c.bf16 %v1174_v18, %v1172_v63 }
 0xf1b   :  { %v999_v9 = vmul.f32 0.5, %v2675_v6  ;;  %v1314_v6 = vld [vmem:[%s3499_s5 + $0x18] sm:$0xff] }
 0xf1c   :  { %v1002_v26 = vadd.f32 0.5, %v1000_v25 }
 0xf1d   :  { %v1001_v11 = vadd.f32 0.5, %v999_v9  ;;  %v3216_v9 = vpack.c.bf16 %v1314_v6, %v1312_v14 }
 0xf1f   :  { %v1006_v19 = vmul.f32 %v1004_v16, %v1001_v11  ;;  %2486 = vmatprep.subr.bf16.mxu0 %v3216_v9 }
 0xf8c   :  { %v1009_v13 = vpop.permute.xlu0 %1008 }
 0xf8d   :  { %v1011_v5 = vmul.f32 %v1009_v13, %v1001_v11  ;;  %v1177_v11 = vld [vmem:[#allocation7 + $0x68] sm:$0xff]  ;;  %v1179_v13 = vld [vmem:[#allocation7 + $0x78] sm:$0xff] }
 0xf8e   :  { %v2481_v16 = vpack.c.bf16 %v1179_v13, %v1177_v11 }
 0xf8f   :  { %1013 = vrot.lane.b32.xlu1 %v1011_v5, %s2857_s3  ;;  %v1311_v5 = vld [vmem:[%s3499_s5] sm:$0xff] }
0x1001   :  { %v1014_v21 = vpop.permute.xlu1 %1013 }
0x1002   :  { %v1016_v23 = vadd.f32 %v1014_v21, %v1006_v19  ;;  %v1313_v19 = vld [vmem:[%s3499_s5 + $0x10] sm:$0xff]  ;;  %v1176_v21 = vld [vmem:[#allocation7 + $0x60] sm:$0xff] }
0x1004   :  { %2676 = vtanh.f32 %v1016_v23  ;;  %v1113_v57 = vrot.slane %v1016_v23, 6  ;;  %v1178_v23 = vld [vmem:[#allocation7 + $0x70] sm:$0xff] }
0x1005   :  { %v2483_v25 = vpack.c.bf16 %v1178_v23, %v1176_v21 }
0x100e   :  { %v2677_v24 = vpop.eup %2676 }
0x100f   :  { %1019 = vrot.lane.b32.xlu0 %v2677_v24, %s2857_s3  ;;  %v3225_v24 = vpack.c.bf16 %v1313_v19, %v1311_v5 }
0x1081   :  { %v1020_v27 = vpop.permute.xlu0 %1019 }
0x1082   :  { %v3191_v30 = vmul.f32 %v1020_v27, %v1002_v26  ;;  %v1316_v26 = vld [vmem:[%s3499_s5 + $0x28] sm:$0xff]  ;;  %v1318_v27 = vld [vmem:[%s3499_s5 + $0x38] sm:$0xff] }
0x1084   :  { %v1024_v33 = vrot.slane %v3191_v30, 4  ;;  %v3199_v37 = vsel %vm241_vm2, %v1135_v31, %v3191_v30  ;;  %v3234_v31 = vpack.c.bf16 %v1318_v27, %v1316_v26 }
0x1086   :  { %2297 = vmatmul.mubr.msk.f32.vlgmr.msra.gmra.mrb[10].mxu0 %vm277_vm6, %v1024_v33  ;;  %v1315_v33 = vld [vmem:[%s3499_s5 + $0x20] sm:$0xff] }
0x1087   :  { %1391 = vmatprep.mubr.f32.mxu0 %v2856_v0  ;;  %2488 = vmatpush1.bf16.msra.mxu0 %v3225_v24 }
0x1088   :  { %2490 = vmatprep.subr.bf16.mxu0 %v3234_v31 }
0x1159   :  { %v1093_v39 = vpop.f32.mrb[10].mxu0 }
0x115a   :  { %v1095_v40 = vpop.f32.mrb[11].mxu0  ;;  %v1100_v46 = vrot.slane %v1093_v39, 2  ;;  %v1317_v39 = vld [vmem:[%s3499_s5 + $0x30] sm:$0xff] }
0x115b   :  { %v1101_v41 = vrot.slane %v1095_v40, 2  ;;  %v3242_v40 = vpack.c.bf16 %v1317_v39, %v1315_v33 }
0x115c   :  { %v1104_v47 = vadd.f32 %v1100_v46, %v3061_v4  ;;  %v2475_v4 = vpack.c.bf16 %v1170_v55, %v1168_v54  ;;  %v1141_v54 = vrot.slane %v3191_v30, 2 }
0x115d   :  { %v1105_v42 = vadd.f32 %v1101_v41, %v3067_v7  ;;  %v1164_v7 = vld [vmem:[#allocation7] sm:$0xff]  ;;  %v1320_v41 = vld [vmem:[%s3499_s5 + $0x48] sm:$0xff]  ;;  %2492 = vmatpush1.bf16.msra.mxu0 %v3242_v40 }
0x115e   :  { %v2471_v52 = vpack.c.bf16 %v1166_v51, %v1164_v7  ;;  %v1325_v7 = vld [vmem:[%s3499_s5 + $0x70] sm:$0xff] }
0x115f   :  { %2678 = vtanh.f32 %v1105_v42  ;;  %v1322_v42 = vld [vmem:[%s3499_s5 + $0x58] sm:$0xff]  ;;  %v3280_v28 = vpack.c.bf16 %v1325_v7, %v1323_v22 }
0x1160   :  { %2680 = vtanh.f32 %v1104_v47  ;;  %2472 = vmatpush1.bf16.msra.mxu1 %v2471_v52  ;;  %v3253_v46 = vpack.c.bf16 %v1322_v42, %v1320_v41  ;;  %v1319_v47 = vld [vmem:[%s3499_s5 + $0x40] sm:$0xff]  ;;  %v1152_v52 = vrot.slane %v3087_v44, 2 }
0x1161   :  { %2474 = vmatprep.subr.bf16.mxu1 %v2473_v53 }
0x1162   :  { %2494 = vmatprep.subr.bf16.mxu0 %v3253_v46 }
0x1164   :  { %2476 = vmatpush1.bf16.msra.mxu1 %v2475_v4 }
0x1165   :  { %2478 = vmatprep.subr.bf16.mxu1 %v2477_v62  ;;  %v1189_v62 = vrot.slane %v1180_v45, %v130_v38 }
0x1168   :  { %2480 = vmatpush1.bf16.msra.mxu1 %v2479_v2 }
0x1169   :  { %v3204_v43 = vpop.eup %2678  ;;  %2482 = vmatprep.subr.bf16.mxu1 %v2481_v16 }
0x116a   :  { %1117 = vrot.lane.b32.xlu1 %v3204_v43, %s2857_s3  ;;  %v2681_v48 = vpop.eup %2680  ;;  %v1109_v51 = vmul.f32 0.5, %v3204_v43 }
0x116b   :  { %v1108_v49 = vmul.f32 0.5, %v2681_v48  ;;  %v1321_v48 = vld [vmem:[%s3499_s5 + $0x50] sm:$0xff] }
0x116c   :  { %2484 = vmatpush1.bf16.msra.mxu1 %v2483_v25  ;;  %v1111_v29 = vadd.f32 0.5, %v1109_v51 }
0x116d   :  { %v1110_v12 = vadd.f32 0.5, %v1108_v49  ;;  %2502 = vmatprep.subr.bf16.mxu1 %v3216_v9  ;;  %v3261_v49 = vpack.c.bf16 %v1321_v48, %v1319_v47 }
0x116f   :  { %v1115_v61 = vmul.f32 %v1113_v57, %v1110_v12  ;;  %2496 = vmatpush1.bf16.msra.mxu0 %v3261_v49  ;;  %v1159_v57 = vsel %vm244_vm3, %v3151_v15, %v1152_v52 }
0x11dc   :  { %v1118_v17 = vpop.permute.xlu1 %1117 }
0x11dd   :  { %v1120_v20 = vmul.f32 %v1118_v17, %v1110_v12  ;;  %v1324_v17 = vld [vmem:[%s3499_s5 + $0x68] sm:$0xff] }
0x11df   :  { %1122 = vrot.lane.b32.xlu0 %v1120_v20, %s2857_s3  ;;  %v1326_v20 = vld [vmem:[%s3499_s5 + $0x78] sm:$0xff] }
0x11e0   :  { %v3275_v50 = vpack.c.bf16 %v1326_v20, %v1324_v17 }
0x11e2   :  { %2498 = vmatprep.subr.bf16.mxu0 %v3275_v50 }
0x11e3   :  { %2500 = vmatpush1.bf16.msra.mxu0 %v3280_v28 }
0x11e4   :  { %2518 = vmatprep.subr.bf16.mxu0 %v3216_v9 }
0x11e6   :  { %1392 = vmatmul.mubr.f32.vlgmr.msra.gmra.mrb[12].mxu0 %v2856_v0 }
0x11e7   :  { %2520 = vmatpush1.bf16.msra.mxu0 %v3225_v24  ;;  %1599 = vmatprep.mubr.f32.mxu0 %v2856_v0 }
0x11e8   :  { %2522 = vmatprep.subr.bf16.mxu0 %v3234_v31 }
0x11eb   :  { %2524 = vmatpush1.bf16.msra.mxu0 %v3242_v40 }
0x11ec   :  { %2526 = vmatprep.subr.bf16.mxu0 %v3253_v46 }
0x11ef   :  { %2528 = vmatpush1.bf16.msra.mxu0 %v3261_v49 }
0x11f0   :  { %2530 = vmatprep.subr.bf16.mxu0 %v3275_v50 }
0x11f3   :  { %2532 = vmatpush1.bf16.msra.mxu0 %v3280_v28 }
0x11f4   :  { %2550 = vmatprep.subr.bf16.mxu0 %v3216_v9 }
0x1251   :  { %v1123_v1 = vpop.permute.xlu0 %1122 }
0x1252   :  { %v1125_v3 = vadd.f32 %v1123_v1, %v1115_v61 }
0x1254   :  { %2682 = vtanh.f32 %v1125_v3 }
0x125e   :  { %v2683_v12 = vpop.eup %2682 }
0x125f   :  { %1128 = vrot.lane.b32.xlu1 %v2683_v12, %s2857_s3 }
0x12d1   :  { %v1129_v32 = vpop.permute.xlu1 %1128 }
0x12d2   :  { %v1131_v53 = vmul.f32 %v1129_v32, %v1111_v29 }
0x12d4   :  { %v1137_v55 = vsel %vm244_vm3, %v3199_v37, %v1131_v53  ;;  %v1139_v4 = vrot.slane %v1131_v53, 6 }
0x12d5   :  { %v1163_v43 = vsel %vm115_vm7, %v1137_v55, %v1159_v57 }
0x12d6   :  { %v1154_v44 = vsel %vm238_vm1, %v1139_v4, %v1141_v54 }
0x12d7   :  { %v1155_v61 = vsel %vm241_vm2, %v1154_v44, %v1143_v58 }
0x12d8   :  { %v1156_v30 = vsel %vm244_vm3, %v1155_v61, %v1145_v60 }
0x12d9   :  { %v1162_v37 = vsel %vm115_vm7, %v3143_v10, %v1156_v30  ;;  %v1393_v10 = vpop.f32.mrb[12].mxu0 }
0x12da   :  { %2298 = vmatmul.mubr.msk.f32.vlgmr.msra.gmra.mrb[8].mxu1 %vm277_vm6, %v1162_v37  ;;  %v1395_v15 = vpop.f32.mrb[13].mxu0 }
0x12db   :  { %1268 = vmatprep.mubr.f32.mxu1 %v2856_v0  ;;  %2504 = vmatpush1.bf16.msra.mxu1 %v3225_v24 }
0x12dc   :  { %2506 = vmatprep.subr.bf16.mxu1 %v3234_v31 }
0x12de   :  { %2299 = vmatmul.mubr.msk.f32.gmra.mrb[10].mxu1 %vm277_vm6, %v1163_v43 }
0x12df   :  { %2508 = vmatpush1.bf16.msra.mxu1 %v3242_v40  ;;  %1490 = vmatprep.mubr.f32.mxu1 %v2856_v0 }
0x12e0   :  { %2510 = vmatprep.subr.bf16.mxu1 %v3253_v46 }
0x12e3   :  { %2512 = vmatpush1.bf16.msra.mxu1 %v3261_v49 }
0x12e4   :  { %2514 = vmatprep.subr.bf16.mxu1 %v3275_v50 }
0x12e7   :  { %2516 = vmatpush1.bf16.msra.mxu1 %v3280_v28 }
0x12e8   :  { %2534 = vmatprep.subr.bf16.mxu1 %v3216_v9 }
0x13ad   :  { %v1264_v63 = vpop.f32.mrb[8].mxu1 }
0x13ae   :  { %v1265_v18 = vadd.f32 %v1264_v63, %v1185_v8  ;;  %v1266_v1 = vpop.f32.mrb[9].mxu1 }
0x13af   :  { %v1267_v2 = vadd.f32 %v1266_v1, %v1189_v62 }
0x13b0   :  { %v1287_v3 = vrot.slane %v1265_v18, 6  ;;  %v1291_v14 = vrot.slane %v1265_v18, 2 }
0x13b1   :  { %v1288_v6 = vrot.slane %v1267_v2, 6  ;;  %v1292_v11 = vrot.slane %v1267_v2, 2  ;;  %v1270_v13 = vpop.f32.mrb[10].mxu1 }
0x13b2   :  { %v1301_v5 = vsel %vm238_vm1, %v1287_v3, %v1291_v14  ;;  %v1271_v16 = vadd.f32 %v1270_v13, %v1185_v8  ;;  %v1272_v19 = vpop.f32.mrb[11].mxu1 }
0x13b3   :  { %v1302_v21 = vsel %vm238_vm1, %v1288_v6, %v1292_v11  ;;  %v1273_v23 = vadd.f32 %v1272_v19, %v1189_v62  ;;  %v1303_v35 = vsel %vm241_vm2, %v1301_v5, %v1287_v3 }
0x13b4   :  { %v1277_v34 = vrot.slane %v1271_v16, 6  ;;  %v1281_v38 = vrot.slane %v1271_v16, 2  ;;  %v1305_v25 = vsel %vm244_vm3, %v1303_v35, %v1291_v14  ;;  %v1304_v26 = vsel %vm241_vm2, %v1302_v21, %v1288_v6 }
0x13b5   :  { %v1278_v27 = vrot.slane %v1273_v23, 6  ;;  %v1282_v33 = vrot.slane %v1273_v23, 2  ;;  %v3336_v39 = vsel %vm3047_vm4, %v1271_v16, %v1305_v25  ;;  %v1306_v41 = vsel %vm244_vm3, %v1304_v26, %v1292_v11 }
0x13b6   :  { %v1295_v42 = vsel %vm238_vm1, %v1277_v34, %v1281_v38  ;;  %v3342_v47 = vsel %vm3052_vm5, %v1273_v23, %v1306_v41 }
0x13b7   :  { %v1296_v48 = vsel %vm238_vm1, %v1278_v27, %v1282_v33  ;;  %v1297_v12 = vsel %vm241_vm2, %v1295_v42, %v1277_v34 }
0x13b8   :  { %v1299_v17 = vsel %vm244_vm3, %v1297_v12, %v1281_v38  ;;  %v1298_v20 = vsel %vm241_vm2, %v1296_v48, %v1278_v27 }
0x13b9   :  { %v3350_v22 = vsel %vm3047_vm4, %v1265_v18, %v1299_v17  ;;  %v1300_v7 = vsel %vm244_vm3, %v1298_v20, %v1282_v33 }
0x13ba   :  { %v3355_v51 = vsel %vm3052_vm5, %v1267_v2, %v1300_v7  ;;  %v1398_v52 = vadd.f32 %v1393_v10, %v3350_v22 }
0x13bb   :  { %v1399_v29 = vadd.f32 %v1395_v15, %v3355_v51 }
0x13bd   :  { %2684 = vtanh.f32 %v1399_v29 }
0x13be   :  { %2686 = vtanh.f32 %v1398_v52 }
0x13c7   :  { %v2685_v32 = vpop.eup %2684 }
0x13c8   :  { %1408 = vrot.lane.b32.xlu0 %v2685_v32, %s2857_s3  ;;  %v2687_v53 = vpop.eup %2686  ;;  %v1403_v60 = vmul.f32 0.5, %v2685_v32 }
0x13c9   :  { %v1402_v54 = vmul.f32 0.5, %v2687_v53 }
0x13ca   :  { %v1405_v44 = vadd.f32 0.5, %v1403_v60 }
0x13cb   :  { %v1404_v56 = vadd.f32 0.5, %v1402_v54 }
0x13cd   :  { %v1406_v57 = vmul.f32 0.0, %v1404_v56 }
0x143a   :  { %v1409_v55 = vpop.permute.xlu0 %1408 }
0x143b   :  { %v1411_v4 = vmul.f32 %v1409_v55, %v1404_v56 }
0x143d   :  { %1413 = vrot.lane.b32.xlu1 %v1411_v4, %s2857_s3 }
0x14af   :  { %v1414_v59 = vpop.permute.xlu1 %1413 }
0x14b0   :  { %v1416_v58 = vadd.f32 %v1414_v59, %v1406_v57 }
0x14b2   :  { %2688 = vtanh.f32 %v1416_v58  ;;  %v1512_v6 = vrot.slane %v1416_v58, 6 }
0x14bc   :  { %v2689_v43 = vpop.eup %2688 }
0x14bd   :  { %1419 = vrot.lane.b32.xlu0 %v2689_v43, %s2857_s3 }
0x152f   :  { %v1420_v61 = vpop.permute.xlu0 %1419 }
0x1530   :  { %v3362_v30 = vmul.f32 %v1420_v61, %v1405_v44 }
0x1532   :  { %2300 = vmatmul.mubr.msk.f32.vlgmr.msra.gmra.mrb[12].mxu1 %vm277_vm6, %v3362_v30 }
0x1533   :  { %2536 = vmatpush1.bf16.msra.mxu1 %v3225_v24  ;;  %1708 = vmatprep.mubr.f32.mxu1 %v2856_v0 }
0x1534   :  { %2538 = vmatprep.subr.bf16.mxu1 %v3234_v31 }
0x1537   :  { %2540 = vmatpush1.bf16.msra.mxu1 %v3242_v40 }
0x1538   :  { %2542 = vmatprep.subr.bf16.mxu1 %v3253_v46 }
0x153b   :  { %2544 = vmatpush1.bf16.msra.mxu1 %v3261_v49 }
0x153c   :  { %2546 = vmatprep.subr.bf16.mxu1 %v3275_v50 }
0x153f   :  { %2548 = vmatpush1.bf16.msra.mxu1 %v3280_v28 }
0x1540   :  { %2566 = vmatprep.subr.bf16.mxu1 %v3216_v9 }
0x1605   :  { %v1492_v37 = vpop.f32.mrb[12].mxu1 }
0x1606   :  { %v1494_v10 = vpop.f32.mrb[13].mxu1  ;;  %v1499_v62 = vrot.slane %v1492_v37, 6 }
0x1607   :  { %v1500_v15 = vrot.slane %v1494_v10, 6 }
0x1608   :  { %v1503_v63 = vadd.f32 %v1499_v62, %v3350_v22 }
0x1609   :  { %v1504_v45 = vadd.f32 %v1500_v15, %v3355_v51 }
0x160b   :  { %2690 = vtanh.f32 %v1504_v45 }
0x160c   :  { %2692 = vtanh.f32 %v1503_v63 }
0x1615   :  { %v2691_v8 = vpop.eup %2690 }
0x1616   :  { %1516 = vrot.lane.b32.xlu1 %v2691_v8, %s2857_s3  ;;  %v2693_v18 = vpop.eup %2692  ;;  %v1508_v19 = vmul.f32 0.5, %v2691_v8 }
0x1617   :  { %v1507_v1 = vmul.f32 0.5, %v2693_v18 }
0x1618   :  { %v1510_v21 = vadd.f32 0.5, %v1508_v19 }
0x1619   :  { %v1509_v2 = vadd.f32 0.5, %v1507_v1 }
0x161b   :  { %v1514_v11 = vmul.f32 %v1512_v6, %v1509_v2 }
0x1688   :  { %v1517_v3 = vpop.permute.xlu1 %1516 }
0x1689   :  { %v1519_v14 = vmul.f32 %v1517_v3, %v1509_v2 }
0x168b   :  { %1521 = vrot.lane.b32.xlu0 %v1519_v14, %s2857_s3 }
0x16fd   :  { %v1522_v13 = vpop.permute.xlu0 %1521 }
0x16fe   :  { %v1524_v5 = vadd.f32 %v1522_v13, %v1514_v11 }
0x1700   :  { %2694 = vtanh.f32 %v1524_v5  ;;  %v1621_v29 = vrot.slane %v1524_v5, 6 }
0x170a   :  { %v2695_v16 = vpop.eup %2694 }
0x170b   :  { %1527 = vrot.lane.b32.xlu1 %v2695_v16, %s2857_s3 }
0x177d   :  { %v1528_v23 = vpop.permute.xlu1 %1527 }
0x177e   :  { %v1530_v35 = vmul.f32 %v1528_v23, %v1510_v21 }
0x1780   :  { %v1532_v34 = vrot.slane %v1530_v35, 2 }
0x1782   :  { %2301 = vmatmul.mubr.msk.f32.vlgmr.msra.gmra.mrb[14].mxu0 %vm277_vm6, %v1532_v34 }
0x1783   :  { %2552 = vmatpush1.bf16.msra.mxu0 %v3225_v24  ;;  %1817 = vmatprep.mubr.f32.mxu0 %v2856_v0 }
0x1784   :  { %2554 = vmatprep.subr.bf16.mxu0 %v3234_v31 }
0x1787   :  { %2556 = vmatpush1.bf16.msra.mxu0 %v3242_v40 }
0x1788   :  { %2558 = vmatprep.subr.bf16.mxu0 %v3253_v46 }
0x178b   :  { %2560 = vmatpush1.bf16.msra.mxu0 %v3261_v49 }
0x178c   :  { %2562 = vmatprep.subr.bf16.mxu0 %v3275_v50 }
0x178f   :  { %2564 = vmatpush1.bf16.msra.mxu0 %v3280_v28 }
0x1790   :  { %2582 = vmatprep.subr.bf16.mxu0 %v3216_v9 }
0x1855   :  { %v1601_v38 = vpop.f32.mrb[14].mxu0 }
0x1856   :  { %v1603_v25 = vpop.f32.mrb[15].mxu0  ;;  %v1608_v41 = vrot.slane %v1601_v38, 4 }
0x1857   :  { %v1609_v26 = vrot.slane %v1603_v25, 4 }
0x1858   :  { %v1612_v42 = vadd.f32 %v1608_v41, %v3350_v22 }
0x1859   :  { %v1613_v27 = vadd.f32 %v1609_v26, %v3355_v51 }
0x185b   :  { %2696 = vtanh.f32 %v1613_v27 }
0x185c   :  { %2698 = vtanh.f32 %v1612_v42 }
0x1865   :  { %v2697_v33 = vpop.eup %2696 }
0x1866   :  { %1625 = vrot.lane.b32.xlu0 %v2697_v33, %s2857_s3  ;;  %v2699_v48 = vpop.eup %2698  ;;  %v1617_v56 = vmul.f32 0.5, %v2697_v33 }
0x1867   :  { %v1616_v12 = vmul.f32 0.5, %v2699_v48 }
0x1868   :  { %v1619_v55 = vadd.f32 0.5, %v1617_v56 }
0x1869   :  { %v1618_v17 = vadd.f32 0.5, %v1616_v12 }
0x186b   :  { %v1623_v32 = vmul.f32 %v1621_v29, %v1618_v17 }
0x18d8   :  { %v1626_v20 = vpop.permute.xlu0 %1625 }
0x18d9   :  { %v1628_v7 = vmul.f32 %v1626_v20, %v1618_v17 }
0x18db   :  { %1630 = vrot.lane.b32.xlu1 %v1628_v7, %s2857_s3 }
0x194d   :  { %v1631_v52 = vpop.permute.xlu1 %1630 }
0x194e   :  { %v1633_v53 = vadd.f32 %v1631_v52, %v1623_v32 }
0x1950   :  { %2700 = vtanh.f32 %v1633_v53 }
0x195a   :  { %v2701_v54 = vpop.eup %2700 }
0x195b   :  { %1636 = vrot.lane.b32.xlu0 %v2701_v54, %s2857_s3 }
0x19cd   :  { %v1637_v4 = vpop.permute.xlu0 %1636 }
0x19ce   :  { %v1639_v57 = vmul.f32 %v1637_v4, %v1619_v55 }
0x19d0   :  { %v1641_v59 = vrot.slane %v1639_v57, 4 }
0x19d2   :  { %2302 = vmatmul.mubr.msk.f32.vlgmr.msra.gmra.mrb[14].mxu1 %vm277_vm6, %v1641_v59 }
0x19d3   :  { %2568 = vmatpush1.bf16.msra.mxu1 %v3225_v24  ;;  %1919 = vmatprep.mubr.f32.mxu1 %v2856_v0 }
0x19d4   :  { %2570 = vmatprep.subr.bf16.mxu1 %v3234_v31 }
0x19d7   :  { %2572 = vmatpush1.bf16.msra.mxu1 %v3242_v40 }
0x19d8   :  { %2574 = vmatprep.subr.bf16.mxu1 %v3253_v46 }
0x19db   :  { %2576 = vmatpush1.bf16.msra.mxu1 %v3261_v49 }
0x19dc   :  { %2578 = vmatprep.subr.bf16.mxu1 %v3275_v50 }
0x19df   :  { %2580 = vmatpush1.bf16.msra.mxu1 %v3280_v28 }
0x19e0   :  { %2598 = vmatprep.subr.bf16.mxu1 %v3216_v9  ;;  %v1730_v9 = vrot.slane %v1633_v53, 6 }
0x1aa5   :  { %v1710_v58 = vpop.f32.mrb[14].mxu1 }
0x1aa6   :  { %v1712_v43 = vpop.f32.mrb[15].mxu1  ;;  %v1717_v37 = vrot.slane %v1710_v58, 2 }
0x1aa7   :  { %v1718_v60 = vrot.slane %v1712_v43, 2 }
0x1aa8   :  { %v1721_v10 = vadd.f32 %v1717_v37, %v3350_v22 }
0x1aa9   :  { %v1722_v44 = vadd.f32 %v1718_v60, %v3355_v51 }
0x1aab   :  { %2702 = vtanh.f32 %v1722_v44 }
0x1aac   :  { %2704 = vtanh.f32 %v1721_v10 }
0x1ab5   :  { %v2703_v61 = vpop.eup %2702 }
0x1ab6   :  { %1734 = vrot.lane.b32.xlu1 %v2703_v61, %s2857_s3  ;;  %v2705_v15 = vpop.eup %2704  ;;  %v1726_v3 = vmul.f32 0.5, %v2703_v61 }
0x1ab7   :  { %v1725_v45 = vmul.f32 0.5, %v2705_v15 }
0x1ab8   :  { %v1728_v14 = vadd.f32 0.5, %v1726_v3 }
0x1ab9   :  { %v1727_v8 = vadd.f32 0.5, %v1725_v45 }
0x1abb   :  { %v1732_v18 = vmul.f32 %v1730_v9, %v1727_v8 }
0x1b28   :  { %v1735_v62 = vpop.permute.xlu1 %1734 }
0x1b29   :  { %v1737_v63 = vmul.f32 %v1735_v62, %v1727_v8 }
0x1b2b   :  { %1739 = vrot.lane.b32.xlu0 %v1737_v63, %s2857_s3 }
0x1b9d   :  { %v1740_v1 = vpop.permute.xlu0 %1739 }
0x1b9e   :  { %v1742_v2 = vadd.f32 %v1740_v1, %v1732_v18 }
0x1ba0   :  { %2706 = vtanh.f32 %v1742_v2  ;;  %v1833_v26 = vrot.slane %v1742_v2, 6 }
0x1baa   :  { %v2707_v51 = vpop.eup %2706 }
0x1bab   :  { %1745 = vrot.lane.b32.xlu1 %v2707_v51, %s2857_s3 }
0x1c1d   :  { %v1746_v6 = vpop.permute.xlu1 %1745 }
0x1c1e   :  { %v1748_v22 = vmul.f32 %v1746_v6, %v1728_v14 }
0x1c20   :  { %v1750_v11 = vrot.slane %v1748_v22, 6 }
0x1c22   :  { %2303 = vmatmul.mubr.msk.f32.vlgmr.msra.gmra.mrb[16].mxu0 %vm277_vm6, %v1750_v11 }
0x1c23   :  { %2584 = vmatpush1.bf16.msra.mxu0 %v3225_v24  ;;  %2028 = vmatprep.mubr.f32.mxu0 %v2856_v0 }
0x1c24   :  { %2586 = vmatprep.subr.bf16.mxu0 %v3234_v31 }
0x1c27   :  { %2588 = vmatpush1.bf16.msra.mxu0 %v3242_v40 }
0x1c28   :  { %2590 = vmatprep.subr.bf16.mxu0 %v3253_v46 }
0x1c2b   :  { %2592 = vmatpush1.bf16.msra.mxu0 %v3261_v49 }
0x1c2c   :  { %2594 = vmatprep.subr.bf16.mxu0 %v3275_v50 }
0x1c2f   :  { %2596 = vmatpush1.bf16.msra.mxu0 %v3280_v28 }
0x1cf5   :  { %v1819_v13 = vpop.f32.mrb[16].mxu0 }
0x1cf6   :  { %v1821_v5 = vpop.f32.mrb[17].mxu0  ;;  %v1824_v21 = vadd.f32 %v1819_v13, %v3336_v39 }
0x1cf7   :  { %v1825_v16 = vadd.f32 %v1821_v5, %v3342_v47 }
0x1cf9   :  { %2708 = vtanh.f32 %v1825_v16 }
0x1cfa   :  { %2710 = vtanh.f32 %v1824_v21 }
0x1d03   :  { %v2709_v19 = vpop.eup %2708 }
0x1d04   :  { %1837 = vrot.lane.b32.xlu0 %v2709_v19, %s2857_s3  ;;  %v2711_v23 = vpop.eup %2710  ;;  %v1829_v48 = vmul.f32 0.5, %v2709_v19 }
0x1d05   :  { %v1828_v35 = vmul.f32 0.5, %v2711_v23 }
0x1d06   :  { %v1831_v12 = vadd.f32 0.5, %v1829_v48 }
0x1d07   :  { %v1830_v34 = vadd.f32 0.5, %v1828_v35 }
0x1d09   :  { %v1835_v27 = vmul.f32 %v1833_v26, %v1830_v34 }
0x1d76   :  { %v1838_v38 = vpop.permute.xlu0 %1837 }
0x1d77   :  { %v1840_v25 = vmul.f32 %v1838_v38, %v1830_v34 }
0x1d79   :  { %1842 = vrot.lane.b32.xlu1 %v1840_v25, %s2857_s3 }
0x1deb   :  { %v1843_v33 = vpop.permute.xlu1 %1842 }
0x1dec   :  { %v1845_v41 = vadd.f32 %v1843_v33, %v1835_v27 }
0x1dee   :  { %2712 = vtanh.f32 %v1845_v41 }
0x1df8   :  { %v2713_v42 = vpop.eup %2712 }
0x1df9   :  { %1848 = vrot.lane.b32.xlu0 %v2713_v42, %s2857_s3 }
0x1e6b   :  { %v1849_v17 = vpop.permute.xlu0 %1848 }
0x1e6c   :  { %v1851_v20 = vmul.f32 %v1849_v17, %v1831_v12  ;;  %v2181_v12 = vld [vmem:[%s3501_s7] sm:$0xff]  ;;  %v2858_v17 = vmov 0.0|0.0  }
0x1e6d   :  { %2613 = vmatprep.subr.bf16.mxu0 %v2858_v17 }
0x1e6e   :  { %2304 = vmatmul.mubr.msk.f32.vlgmr.msra.gmra.mrb[16].mxu1 %vm277_vm6, %v1851_v20 }
0x1e6f   :  { %2600 = vmatpush1.bf16.msra.mxu1 %v3225_v24  ;;  %2137 = vmatprep.mubr.f32.mxu1 %v2856_v0 }
0x1e70   :  { %2602 = vmatprep.subr.bf16.mxu1 %v3234_v31 }
0x1e73   :  { %2604 = vmatpush1.bf16.msra.mxu1 %v3242_v40 }
0x1e74   :  { %2606 = vmatprep.subr.bf16.mxu1 %v3253_v46 }
0x1e77   :  { %2608 = vmatpush1.bf16.msra.mxu1 %v3261_v49 }
0x1e78   :  { %2610 = vmatprep.subr.bf16.mxu1 %v3275_v50 }
0x1e7b   :  { %2612 = vmatpush1.bf16.msra.mxu1 %v3280_v28  ;;  %v1941_v28 = vrot.slane %v1845_v41, 6 }
0x1f41   :  { %v1921_v7 = vpop.f32.mrb[16].mxu1 }
0x1f42   :  { %v1923_v29 = vpop.f32.mrb[17].mxu1  ;;  %v1928_v31 = vrot.slane %v1921_v7, 6  ;;  %v2184_v7 = vld [vmem:[%s3501_s7 + $0x18] sm:$0xff] }
0x1f43   :  { %v1929_v32 = vrot.slane %v1923_v29, 6 }
0x1f44   :  { %v1932_v40 = vadd.f32 %v1928_v31, %v3336_v39 }
0x1f45   :  { %v1933_v52 = vadd.f32 %v1929_v32, %v3342_v47  ;;  %v2185_v32 = vld [vmem:[%s3501_s7 + $0x20] sm:$0xff] }
0x1f47   :  { %2714 = vtanh.f32 %v1933_v52  ;;  %v2186_v52 = vld [vmem:[%s3501_s7 + $0x28] sm:$0xff] }
0x1f48   :  { %2716 = vtanh.f32 %v1932_v40 }
0x1f51   :  { %v2715_v24 = vpop.eup %2714 }
0x1f52   :  { %1945 = vrot.lane.b32.xlu1 %v2715_v24, %s2857_s3  ;;  %v2717_v46 = vpop.eup %2716  ;;  %v1937_v59 = vmul.f32 0.5, %v2715_v24  ;;  %v2620_v24 = vpack.c.bf16 %v2186_v52, %v2185_v32 }
0x1f53   :  { %v1936_v53 = vmul.f32 0.5, %v2717_v46 }
0x1f54   :  { %v1939_v58 = vadd.f32 0.5, %v1937_v59 }
0x1f55   :  { %v1938_v49 = vadd.f32 0.5, %v1936_v53  ;;  %v2187_v53 = vld [vmem:[%s3501_s7 + $0x30] sm:$0xff] }
0x1f57   :  { %v1943_v56 = vmul.f32 %v1941_v28, %v1938_v49 }
0x1fc4   :  { %v1946_v54 = vpop.permute.xlu1 %1945 }
0x1fc5   :  { %v1948_v50 = vmul.f32 %v1946_v54, %v1938_v49  ;;  %v2188_v49 = vld [vmem:[%s3501_s7 + $0x38] sm:$0xff] }
0x1fc7   :  { %1950 = vrot.lane.b32.xlu0 %v1948_v50, %s2857_s3  ;;  %v2623_v50 = vpack.c.bf16 %v2188_v49, %v2187_v53 }
0x2039   :  { %v1951_v55 = vpop.permute.xlu0 %1950 }
0x203a   :  { %v1953_v4 = vadd.f32 %v1951_v55, %v1943_v56 }
0x203c   :  { %2718 = vtanh.f32 %v1953_v4  ;;  %v2050_v51 = vrot.slane %v1953_v4, 6 }
0x2046   :  { %v2719_v57 = vpop.eup %2718 }
0x2047   :  { %1956 = vrot.lane.b32.xlu1 %v2719_v57, %s2857_s3  ;;  %v2178_v57 = vrot.slane %v3362_v30, 2 }
0x20b9   :  { %v1957_v43 = vpop.permute.xlu1 %1956 }
0x20ba   :  { %v1959_v60 = vmul.f32 %v1957_v43, %v1939_v58 }
0x20bc   :  { %v1961_v44 = vrot.slane %v1959_v60, 2  ;;  %v2307_v60 = vld [vmem:[%s3502_s8] ss:$0 sm:$0xff] }
0x20be   :  { %2305 = vmatmul.mubr.msk.f32.vlgmr.msra.gmra.mrb[18].mxu0 %vm277_vm6, %v1961_v44 }
0x20bf   :  { %2334 = vmatprep.mubr.msk.f32.mxu0 %vm2859_vm8, %v2856_v0 }
0x2191   :  { %v2030_v61 = vpop.f32.mrb[18].mxu0 }
0x2192   :  { %v2032_v37 = vpop.f32.mrb[19].mxu0  ;;  %v2037_v8 = vrot.slane %v2030_v61, 4 }
0x2193   :  { %v2038_v10 = vrot.slane %v2032_v37, 4 }
0x2194   :  { %v2041_v62 = vadd.f32 %v2037_v8, %v3336_v39 }
0x2195   :  { %v2042_v15 = vadd.f32 %v2038_v10, %v3342_v47 }
0x2197   :  { %2720 = vtanh.f32 %v2042_v15 }
0x2198   :  { %2722 = vtanh.f32 %v2041_v62 }
0x21a1   :  { %v2721_v45 = vpop.eup %2720 }
0x21a2   :  { %2054 = vrot.lane.b32.xlu0 %v2721_v45, %s2857_s3  ;;  %v2723_v63 = vpop.eup %2722  ;;  %v2046_v11 = vmul.f32 0.5, %v2721_v45 }
0x21a3   :  { %v2045_v9 = vmul.f32 0.5, %v2723_v63 }
0x21a4   :  { %v2048_v13 = vadd.f32 0.5, %v2046_v11 }
0x21a5   :  { %v2047_v18 = vadd.f32 0.5, %v2045_v9 }
0x21a7   :  { %v2052_v3 = vmul.f32 %v2050_v51, %v2047_v18 }
0x2214   :  { %v2055_v1 = vpop.permute.xlu0 %2054 }
0x2215   :  { %v2057_v2 = vmul.f32 %v2055_v1, %v2047_v18 }
0x2217   :  { %2059 = vrot.lane.b32.xlu1 %v2057_v2, %s2857_s3 }
0x2289   :  { %v2060_v14 = vpop.permute.xlu1 %2059 }
0x228a   :  { %v2062_v6 = vadd.f32 %v2060_v14, %v2052_v3 }
0x228c   :  { %2724 = vtanh.f32 %v2062_v6  ;;  %v2159_v31 = vrot.slane %v2062_v6, 6 }
0x2296   :  { %v2725_v22 = vpop.eup %2724 }
0x2297   :  { %2065 = vrot.lane.b32.xlu0 %v2725_v22, %s2857_s3 }
0x2309   :  { %v2066_v5 = vpop.permute.xlu0 %2065 }
0x230a   :  { %v2068_v16 = vmul.f32 %v2066_v5, %v2048_v13 }
0x230c   :  { %v2070_v19 = vrot.slane %v2068_v16, 4 }
0x230e   :  { %2306 = vmatmul.mubr.msk.f32.vlgmr.msra.gmra.mrb[18].mxu1 %vm277_vm6, %v2070_v19 }
0x23e1   :  { %v2139_v21 = vpop.f32.mrb[18].mxu1 }
0x23e2   :  { %v2141_v23 = vpop.f32.mrb[19].mxu1  ;;  %v2146_v25 = vrot.slane %v2139_v21, 2 }
0x23e3   :  { %v2147_v35 = vrot.slane %v2141_v23, 2 }
0x23e4   :  { %v2150_v26 = vadd.f32 %v2146_v25, %v3336_v39  ;;  %v2183_v39 = vld [vmem:[%s3501_s7 + $0x10] sm:$0xff] }
0x23e5   :  { %v2151_v34 = vadd.f32 %v2147_v35, %v3342_v47  ;;  %v2182_v47 = vld [vmem:[%s3501_s7 + $0x8] sm:$0xff]  ;;  %v2617_v29 = vpack.c.bf16 %v2184_v7, %v2183_v39 }
0x23e6   :  { %v2614_v20 = vpack.c.bf16 %v2182_v47, %v2181_v12 }
0x23e7   :  { %2726 = vtanh.f32 %v2151_v34 }
0x23e8   :  { %2728 = vtanh.f32 %v2150_v26  ;;  %2615 = vmatpush3.bf16.msra.mxu0 %v2614_v20 }
0x23e9   :  { %2616 = vmatprep.subr.bf16.mxu0 %v2858_v17 }
0x23ec   :  { %2618 = vmatpush3.bf16.msra.mxu0 %v2617_v29 }
0x23ed   :  { %2619 = vmatprep.subr.bf16.mxu0 %v2858_v17 }
0x23f0   :  { %2621 = vmatpush3.bf16.msra.mxu0 %v2620_v24 }
0x23f1   :  { %v2727_v38 = vpop.eup %2726  ;;  %2622 = vmatprep.subr.bf16.mxu0 %v2858_v17 }
0x23f2   :  { %2163 = vrot.lane.b32.xlu1 %v2727_v38, %s2857_s3  ;;  %v2729_v27 = vpop.eup %2728  ;;  %v2155_v56 = vmul.f32 0.5, %v2727_v38 }
0x23f3   :  { %v2154_v33 = vmul.f32 0.5, %v2729_v27 }
0x23f4   :  { %2624 = vmatpush3.bf16.msra.mxu0 %v2623_v50  ;;  %v2157_v55 = vadd.f32 0.5, %v2155_v56 }
0x23f5   :  { %v2156_v41 = vadd.f32 0.5, %v2154_v33 }
0x23f7   :  { %v2161_v40 = vmul.f32 %v2159_v31, %v2156_v41 }
0x2464   :  { %v2164_v42 = vpop.permute.xlu1 %2163 }
0x2465   :  { %v2166_v48 = vmul.f32 %v2164_v42, %v2156_v41 }
0x2467   :  { %2168 = vrot.lane.b32.xlu0 %v2166_v48, %s2857_s3 }
0x24d9   :  { %v2169_v46 = vpop.permute.xlu0 %2168 }
0x24da   :  { %v2171_v54 = vadd.f32 %v2169_v46, %v2161_v40 }
0x24dc   :  { %2730 = vtanh.f32 %v2171_v54 }
0x24e6   :  { %v2731_v28 = vpop.eup %2730 }
0x24e7   :  { %2174 = vrot.lane.b32.xlu1 %v2731_v28, %s2857_s3  ;;  %s2820_s3 = scalar_lea.vmem %s2279_s16, 32 }
0x24e8   :  { %p2821_p4 = scmp.ne.s32.totalorder %s2279_s16, %s2820_s3  ;;  %p2826_p6 = scmp.lt.s32.totalorder %s2820_s3, %s2820_s3 }
0x24ea   :  { %p2827_p7 = por %p2826_p6, %p2825_p5 }
0x24ec   :  { %p2828_p8 = pnand %p2827_p7, %p2821_p4 }
0x2559   :  { %v2175_v4 = vpop.permute.xlu1 %2174 }
0x255a   :  { %v2177_v59 = vmul.f32 %v2175_v4, %v2157_v55 }
0x255c   :  { %v2180_v58 = vsel %vm115_vm7, %v2177_v59, %v2178_v57 }
0x255d   :  { %v2197_v43 = vrot.slane %v2180_v58, 6 }
0x255f   :  { %2335 = vmatmul.mubr.msk.f32.vlgmr.msra.gmra.mrb[20].mxu0 %vm277_vm6, %v2197_v43 }
0x2632   :  { %v2266_v0 = vpop.f32.mrb[20].mxu0 }
0x2633   :  { %v2267_v44 = vadd.f32 %v2307_v60, %v2266_v0  ;;  %v2336_v61 = vpop.f32.mrb[21].mxu0 }
0x2635   :  { %2271 = vst.msk [vmem:[#allocation10] sm:$0x3] %vm2270_vm9, %v2267_v44 }
0x2636   :  { %2831 = shalt.err (!%p2828_p8)
}
0x2637   :  { %s2832_s18 = scalar_lea.hbm %s3503_s9, 32 }
0x2638   :  { %p2833_p9 = scmp.ne.s32.totalorder %s3503_s9, %s2832_s18  ;;  %p2836_p10 = scmp.lt.u32.totalorder %s2832_s18, %s3503_s9 }
0x263a   :  { %p2838_p11 = pnand %p2836_p10, %p2833_p9 }
0x263c   :  { %2841 = shalt.err (!%p2838_p11)
}
0x263d   :  { %2281 = dma.vmem_to_hbm [thread:$0]  %s2279_s16, 32, %s3503_s9, [#allocation4]  }
0x263e   :  { %2848 = dma.done.wait [#allocation4], 32  }
0x263f   :  { %2849 = vsyncadd [#allocation4], 4294967264 }
0x2640   :  { %2285 = vsyncpa [#allocation3], 1 }
0x2641   :  { %2286 = vsyncpa [#allocation6], 1 }
0x2642   :  { %2287 = vsyncpa [#allocation9], 1 }
0x2643   :  { %2288 = vsyncpa [#allocation4], 1 }

</bundles_post_ra>
